<compile_context>
chip_gen: v7x
topology: tpu7x:2x2x1
jax: 0.10.0
libtpu: 0.0.40
codegen_flags: <defaults>
</compile_context>

<pallas_src>
import functools

import numpy as np
import jax
import jax.numpy as jnp
from jax import lax
from jax.experimental import pallas as pl
from jax.experimental.pallas import tpu as pltpu

_LOG2PI = -0.5 * float(np.log(2.0 * np.pi))


def _leaky(v):
    return jnp.where(v >= 0, v, 0.2 * v)


# ----------------------------- Pallas kernel ------------------------------ #

def _fg_agent_kernel(C, T, gc, nr, n_rdb, m, B_blk,
                     x_ref, eps_ref, wdil_ref, wfin_ref, bias_ref, proj_ref,
                     aux_ref, out_ref, cat_ref):
    """Full FGAgent forward for B_blk batch elements (one grid step).

    x_ref    : (C, L)  input slab, L = B_blk*T (lanes = batch-major time)
    eps_ref  : (1, B_blk, C*m)  reparameterisation noise
    wdil_ref : (n_rdb*nr*3*gc, Cmax) f32  zero-padded per-tap dilated weights
    wfin_ref : (n_rdb*C, Ctot)  f32  conv_last with shortcut folded in
    bias_ref : (n_rdb*nr*gc + n_rdb*C, 1) f32  all conv biases
    proj_ref : (C+1, 2*C*m) f32  [w_proj^T ; b_proj]
    aux_ref  : (2*nr + B_blk, L) f32  periodic halo masks + pooling selector
    out_ref  : (1, B_blk, 4*C*m)  packed [mu | logvar | action | log_prob_sum]
    cat_ref  : (Ctot, L) f32 VMEM scratch  dense-concat feature buffer
    """
    f32 = jnp.float32
    bf16 = jnp.bfloat16
    L = B_blk * T
    cm = C * m
    Cmax = C + (nr - 1) * gc          # widest dilated-conv input width
    Ctot = C + nr * gc                # dense-concat width (final conv input)

    # Grid-invariant masks (periodic in T) + per-element pooling selector.
    mask_l = [aux_ref[pl.ds(i, 1), :] for i in range(nr)]          # (1, L) each
    mask_r = [aux_ref[pl.ds(nr + i, 1), :] for i in range(nr)]
    sel = aux_ref[pl.ds(2 * nr, B_blk), :]                         # (B_blk, L)

    # Rows C..Ctot can be read (times zero-padded weights) before being written
    # in the first block; make sure they are finite (NaN * 0 = NaN).
    cat_ref[pl.ds(C, Ctot - C), :] = jnp.zeros((Ctot - C, L), f32)

    out = x_ref[...].astype(f32)                                   # (C, L)

    for b in range(n_rdb):                                         # unrolled
        cat_ref[pl.ds(0, C), :] = out
        for i in range(nr):                                        # unrolled
            d = 2 ** i
            row = ((b * nr + i) * 3) * gc
            w_l = wdil_ref[pl.ds(row, gc), :].astype(bf16)          # (gc, Cmax)
            w_c = wdil_ref[pl.ds(row + gc, gc), :].astype(bf16)
            w_r = wdil_ref[pl.ds(row + 2 * gc, gc), :].astype(bf16)
            bia = bias_ref[pl.ds((b * nr + i) * gc, gc), :]         # (gc, 1)

            cur_f = cat_ref[pl.ds(0, Cmax), :]                      # (Cmax, L) f32
            cur = cur_f.astype(bf16)
            x_m = pltpu.roll(cur_f, shift=d, axis=1).astype(bf16)       # x[t-d]
            x_p = pltpu.roll(cur_f, shift=L - d, axis=1).astype(bf16)   # x[t+d]
            # mask after the matmul: the dot does not mix lanes, so
            # w @ (x * mask) == (w @ x) * mask and the (gc, L) mul is cheaper.
            conv = (jnp.dot(w_c, cur, preferred_element_type=f32)
                    + jnp.dot(w_l, x_m, preferred_element_type=f32) * mask_l[i]
                    + jnp.dot(w_r, x_p, preferred_element_type=f32) * mask_r[i]
                    + bia)                                          # (gc, L)
            cat_ref[pl.ds(C + i * gc, gc), :] = _leaky(conv)

        # conv_last(cat) + shortcut(x) folded into one matmul
        w_f = wfin_ref[pl.ds(b * C, C), :].astype(bf16)             # (C, Ctot)
        b_f = bias_ref[pl.ds(n_rdb * nr * gc + b * C, C), :]        # (C, 1)
        out = _leaky(jnp.dot(w_f, cat_ref[...].astype(bf16),
                             preferred_element_type=f32) + b_f)     # (C, L)

    # adaptive_avg_pool1d(out, 1) per element: selector matmul (B_blk,L)x(C,L)->(B_blk,C)
    pooled = lax.dot_general(sel, out, (((1,), (1,)), ((), ())),
                             preferred_element_type=f32)            # (B_blk, C)
    stats = (jnp.dot(pooled, proj_ref[pl.ds(0, C), :],
                     preferred_element_type=f32)
             + proj_ref[pl.ds(C, 1), :])                            # (B_blk, 2*cm)

    mu = stats[:, :cm]
    logvar = jnp.clip(stats[:, cm:], -10.0, 10.0)
    eps = eps_ref[0]                                                # (B_blk, cm)
    action = mu + eps * jnp.exp(0.5 * logvar)
    # (action - mu)^2 / var == eps^2 exactly -> drop one exp and the divide.
    lp = _LOG2PI - 0.5 * logvar - 0.5 * eps * eps
    lps = jnp.sum(lp, axis=1, keepdims=True)                        # (B_blk, 1)

    out_ref[0] = jnp.concatenate(
        [mu, logvar, action, jnp.broadcast_to(lps, (B_blk, cm))],
        axis=1).astype(out_ref.dtype)


# ------------------------------- wrapper ----------------------------------- #

def _pick_batch_block(n, cap=8):
    """Largest divisor of n that is <= cap and leaves >=2 grid steps (if n>=2)."""
    target = max(1, n // 2) if n >= 2 else 1
    b = max(1, min(cap, target))
    while n % b:
        b -= 1
    return b


def fg_agent_forward(x, eps, kp):
    """x: (N, C, T) f32 (PyTorch layout), eps: (N, C*m) f32, kp: prepared params.

    Returns (mu, logvar_clamped, action, log_prob_sum) like FGAgent.forward.
    """
    N, C, T = x.shape
    m, gc, nr, n_rdb = kp["kernel_size"], kp["growth"], kp["n_dilated"], kp["n_rdb"]
    cm = C * m
    Ctot = C + nr * gc
    assert T % 128 == 0, "time axis must be lane aligned"  # TODO(synk): pad/tile generic T

    B_blk = _pick_batch_block(N)
    n_steps = N // B_blk
    L = B_blk * T

    # Layout plumbing kept in the wrapper (cheap one-off XLA ops): the kernel
    # sees a lane-dense channels-first (C, B_blk*T) slab per grid step.
    x_cf = jnp.transpose(x, (1, 0, 2)).reshape(C, N * T)
    eps_r = eps.reshape(n_steps, B_blk, cm)

    # Grid-invariant aux slab: periodic halo masks + per-element pooling selector.
    tloc = np.arange(L) % T
    rows = [(tloc >= 2 ** i).astype(np.float32) for i in range(nr)]
    rows += [(tloc < T - 2 ** i).astype(np.float32) for i in range(nr)]
    sel = np.zeros((B_blk, L), np.float32)
    for j in range(B_blk):
        sel[j, j * T:(j + 1) * T] = 1.0 / T
    aux = jnp.asarray(np.concatenate([np.stack(rows, axis=0), sel], axis=0))

    kern = functools.partial(_fg_agent_kernel, C, T, gc, nr, n_rdb, m, B_blk)

    in_specs = [
        pl.BlockSpec((C, L), lambda n: (0, n)),                     # x slab
        pl.BlockSpec((1, B_blk, cm), lambda n: (n, 0, 0)),          # eps
        pl.BlockSpec(kp["w_dil"].shape, lambda n: (0, 0)),          # invariant slabs
        pl.BlockSpec(kp["w_fin"].shape, lambda n: (0, 0)),          #  -> fetched once
        pl.BlockSpec(kp["bias"].shape, lambda n: (0, 0)),
        pl.BlockSpec(kp["proj"].shape, lambda n: (0, 0)),
        pl.BlockSpec(aux.shape, lambda n: (0, 0)),
    ]
    out_specs = pl.BlockSpec((1, B_blk, 4 * cm), lambda n: (n, 0, 0))
    out_shape = jax.ShapeDtypeStruct((n_steps, B_blk, 4 * cm), jnp.float32)

    packed = pl.pallas_call(
        kern,
        out_shape=out_shape,
        grid=(n_steps,),
        in_specs=in_specs,
        out_specs=out_specs,
        scratch_shapes=[pltpu.VMEM((Ctot, L), jnp.float32)],
        compiler_params=pltpu.CompilerParams(
            dimension_semantics=("parallel",)),
    )(x_cf, eps_r, kp["w_dil"], kp["w_fin"], kp["bias"], kp["proj"], aux)

    packed = packed.reshape(N, 4 * cm)
    mu = packed[:, :cm]
    lv = packed[:, cm:2 * cm]
    action = packed[:, 2 * cm:3 * cm].reshape(N, C, m)
    log_prob_sum = packed[:, 3 * cm]
    return mu, lv, action, log_prob_sum


# -------------------------- parameter construction ------------------------ #

def make_params(key, channels, kernel_size, n_rdb, growth, n_dilated):
    """Random params in PyTorch layout (used by the pure-JAX reference).
    (PyTorch init zeroes the biases; small random biases are used here only to
    exercise the bias path -- forward semantics are unchanged.)"""
    def kaiming(k, shape, fan_in):
        return jax.random.normal(k, shape, jnp.float32) * np.sqrt(2.0 / fan_in)

    blocks = []
    for _ in range(n_rdb):
        w_dil, b_dil = [], []
        in_ch = channels
        for _i in range(n_dilated):
            key, kw, kb = jax.random.split(key, 3)
            w_dil.append(kaiming(kw, (growth, in_ch, 3), in_ch * 3))
            b_dil.append(0.1 * jax.random.normal(kb, (growth,), jnp.float32))
            in_ch += growth
        key, k1, k2, k3, k4 = jax.random.split(key, 5)
        blocks.append(dict(
            w_dil=w_dil, b_dil=b_dil,
            w_last=kaiming(k1, (channels, in_ch, 1), in_ch),
            b_last=0.1 * jax.random.normal(k2, (channels,), jnp.float32),
            w_sc=kaiming(k3, (channels, channels, 1), channels),
            b_sc=0.1 * jax.random.normal(k4, (channels,), jnp.float32),
        ))
    key, kw, kb = jax.random.split(key, 3)
    out_dim = 2 * channels * kernel_size
    return dict(
        channels=channels, kernel_size=kernel_size, n_rdb=n_rdb,
        growth=growth, n_dilated=n_dilated, blocks=blocks,
        w_proj=kaiming(kw, (out_dim, channels, 1), channels),
        b_proj=0.1 * jax.random.normal(kb, (out_dim,), jnp.float32),
    )


def prepare_kernel_params(p):
    """One-time repack of PyTorch-layout params into the fused kernel layout
    (hoisted out of the forward hot path): consolidated, lane-friendly slabs."""
    c, gc, nr = p["channels"], p["growth"], p["n_dilated"]
    n_rdb, m = p["n_rdb"], p["kernel_size"]
    Cmax = c + (nr - 1) * gc

    # Per-tap dilated weights, zero-padded along the input-channel axis to Cmax,
    # row layout: ((block*nr + layer)*3 + tap)*gc, tap order = (x[t-d], x[t], x[t+d]).
    wdil_rows, bdil = [], []
    for blk in p["blocks"]:
        for i in range(nr):
            w = blk["w_dil"][i]                                    # (gc, cin, 3)
            cin = w.shape[1]
            for tap in range(3):
                wdil_rows.append(jnp.pad(w[:, :, tap], ((0, 0), (0, Cmax - cin))))
            bdil.append(blk["b_dil"][i])
    w_dil = jnp.concatenate(wdil_rows, axis=0).astype(jnp.float32)  # (n_rdb*nr*3*gc, Cmax)

    # conv_last with the 1x1 shortcut folded into its first `c` input channels.
    wfin_rows, bfin = [], []
    for blk in p["blocks"]:
        wf = blk["w_last"][:, :, 0].at[:, :c].add(blk["w_sc"][:, :, 0])
        wfin_rows.append(wf)
        bfin.append(blk["b_last"] + blk["b_sc"])
    w_fin = jnp.concatenate(wfin_rows, axis=0).astype(jnp.float32)  # (n_rdb*c, c+nr*gc)

    bias = jnp.concatenate(bdil + bfin)[:, None].astype(jnp.float32)

    proj = jnp.concatenate(
        [jnp.transpose(p["w_proj"][:, :, 0]), p["b_proj"][None, :]],
        axis=0).astype(jnp.float32)                                  # (c+1, 2*c*m)

    return dict(channels=c, kernel_size=m, growth=gc, n_dilated=nr, n_rdb=n_rdb,
                w_dil=w_dil, w_fin=w_fin, bias=bias, proj=proj)


# ------------------------------ JAX reference ------------------------------ #

def _rdb_ref(x, blk):
    cat = x
    for i, (w, b) in enumerate(zip(blk["w_dil"], blk["b_dil"])):
        d = 2 ** i
        conv = lax.conv_general_dilated(
            cat, w, window_strides=(1,), padding=[(d, d)], rhs_dilation=(d,),
            dimension_numbers=("NCH", "OIH", "NCH")) + b.reshape(1, -1, 1)
        cat = jnp.concatenate([cat, _leaky(conv)], axis=1)
    out = lax.conv_general_dilated(
        cat, blk["w_last"], window_strides=(1,), padding=[(0, 0)],
        dimension_numbers=("NCH", "OIH", "NCH")) + blk["b_last"].reshape(1, -1, 1)
    sc = lax.conv_general_dilated(
        x, blk["w_sc"], window_strides=(1,), padding=[(0, 0)],
        dimension_numbers=("NCH", "OIH", "NCH")) + blk["b_sc"].reshape(1, -1, 1)
    return _leaky(out + sc)


def fg_agent_ref(x, p, eps):
    out = x
    for blk in p["blocks"]:
        out = _rdb_ref(out, blk)
    pooled = jnp.mean(out, axis=2, keepdims=True)                    # (N, C, 1)
    stats = lax.conv_general_dilated(
        pooled, p["w_proj"], window_strides=(1,), padding=[(0, 0)],
        dimension_numbers=("NCH", "OIH", "NCH")) + p["b_proj"].reshape(1, -1, 1)
    stats = stats[:, :, 0]                                           # (N, 2*c*m)
    cm = p["channels"] * p["kernel_size"]
    mu = stats[:, :cm]
    logvar = jnp.clip(stats[:, cm:], -10.0, 10.0)
    std = jnp.exp(0.5 * logvar)
    action = mu + eps * std
    var = jnp.exp(logvar)
    log_prob = _LOG2PI - 0.5 * logvar - 0.5 * (action - mu) ** 2 / var
    log_prob_sum = jnp.sum(log_prob, axis=1)
    return mu, logvar, action.reshape(-1, p["channels"], p["kernel_size"]), log_prob_sum


# ----------------------------------- main ---------------------------------- #

if __name__ == "__main__":
    N, C, T = 4, 16, 128
    kernel_size, n_rdb, growth, n_dilated = 8, 2, 8, 3   # dilations 1, 2, 4

    key = jax.random.PRNGKey(0)
    key, kx, ke = jax.random.split(key, 3)
    x = jax.random.normal(kx, (N, C, T), jnp.float32)           # (N, C, T)
    # torch.randn_like noise is drawn in the wrapper and passed in (deterministic kernel)
    eps = jax.random.normal(ke, (N, C * kernel_size), jnp.float32)

    params = make_params(key, C, kernel_size, n_rdb, growth, n_dilated)
    kp = prepare_kernel_params(params)

    mu, lv, action, lps = fg_agent_forward(x, eps, kp)
    jax.block_until_ready((mu, lv, action, lps))

    mu_r, lv_r, action_r, lps_r = fg_agent_ref(x, params, eps)
    jax.block_until_ready((mu_r, lv_r, action_r, lps_r))

    assert mu.shape == (N, C * kernel_size)
    assert lv.shape == (N, C * kernel_size)
    assert action.shape == (N, C, kernel_size)
    assert lps.shape == (N,)
    # bf16 MXU operands (f32 accumulation) -> slightly relaxed tolerance
    for got, ref in ((mu, mu_r), (lv, lv_r), (action, action_r), (lps, lps_r)):
        assert np.allclose(np.asarray(got), np.asarray(ref), rtol=3e-2, atol=3e-2)

    print("KERNEL_OK")
</pallas_src>

<mosaic_0001>
module attributes {stable_mosaic.version = 11 : i64} {
  func.func @_fg_agent_kernel(%arg0: i32, %arg1: memref<16x256xf32, #tpu.memory_space<vmem>>, %arg2: memref<1x2x128xf32, #tpu.memory_space<vmem>>, %arg3: memref<144x32xf32, #tpu.memory_space<vmem>>, %arg4: memref<32x40xf32, #tpu.memory_space<vmem>>, %arg5: memref<80x1xf32, #tpu.memory_space<vmem>>, %arg6: memref<17x256xf32, #tpu.memory_space<vmem>>, %arg7: memref<8x256xf32, #tpu.memory_space<vmem>>, %arg8: memref<1x2x512xf32, #tpu.memory_space<vmem>>, %arg9: memref<40x256xf32, #tpu.memory_space<vmem>>) attributes {dimension_semantics = [#tpu.dimension_semantics<parallel>], iteration_bounds = array<i64: 2>, scalar_prefetch = 0 : i64, scratch_operands = 1 : i64, tpu.core_type = #tpu.core_type<tc>, window_params = [{transform_indices = @transform_0, window_bounds = array<i64: 16, 256>}, {transform_indices = @transform_1, window_bounds = array<i64: 1, 2, 128>}, {pipeline_mode = #tpu.pipeline_mode<synchronous>, transform_indices = @transform_2, window_bounds = array<i64: 144, 32>}, {pipeline_mode = #tpu.pipeline_mode<synchronous>, transform_indices = @transform_3, window_bounds = array<i64: 32, 40>}, {pipeline_mode = #tpu.pipeline_mode<synchronous>, transform_indices = @transform_4, window_bounds = array<i64: 80, 1>}, {pipeline_mode = #tpu.pipeline_mode<synchronous>, transform_indices = @transform_5, window_bounds = array<i64: 17, 256>}, {pipeline_mode = #tpu.pipeline_mode<synchronous>, transform_indices = @transform_6, window_bounds = array<i64: 8, 256>}, {transform_indices = @transform_7, window_bounds = array<i64: 1, 2, 512>}]} {
    %c0 = arith.constant 0 : index
    %c0_0 = arith.constant 0 : index
    %0 = vector.load %arg7[%c0, %c0_0] : memref<8x256xf32, #tpu.memory_space<vmem>>, vector<1x256xf32>
    %c1 = arith.constant 1 : index
    %c0_1 = arith.constant 0 : index
    %1 = vector.load %arg7[%c1, %c0_1] : memref<8x256xf32, #tpu.memory_space<vmem>>, vector<1x256xf32>
    %c2 = arith.constant 2 : index
    %c0_2 = arith.constant 0 : index
    %2 = vector.load %arg7[%c2, %c0_2] : memref<8x256xf32, #tpu.memory_space<vmem>>, vector<1x256xf32>
    %c3 = arith.constant 3 : index
    %c0_3 = arith.constant 0 : index
    %3 = vector.load %arg7[%c3, %c0_3] : memref<8x256xf32, #tpu.memory_space<vmem>>, vector<1x256xf32>
    %c4 = arith.constant 4 : index
    %c0_4 = arith.constant 0 : index
    %4 = vector.load %arg7[%c4, %c0_4] : memref<8x256xf32, #tpu.memory_space<vmem>>, vector<1x256xf32>
    %c5 = arith.constant 5 : index
    %c0_5 = arith.constant 0 : index
    %5 = vector.load %arg7[%c5, %c0_5] : memref<8x256xf32, #tpu.memory_space<vmem>>, vector<1x256xf32>
    %c6 = arith.constant 6 : index
    %c0_6 = arith.constant 0 : index
    %6 = vector.load %arg7[%c6, %c0_6] : memref<8x256xf32, #tpu.memory_space<vmem>>, vector<2x256xf32>
    %cst = arith.constant 0.000000e+00 : f32
    %7 = vector.broadcast %cst : f32 to vector<24x256xf32>
    %c16 = arith.constant 16 : index
    %c0_7 = arith.constant 0 : index
    %8 = vector.load %arg9[%c16, %c0_7] : memref<40x256xf32, #tpu.memory_space<vmem>>, vector<24x256xf32>
    tpu.vector_store %arg9[%c16, %c0_7], %7 {strides = array<i32>} : memref<40x256xf32, #tpu.memory_space<vmem>>, vector<24x256xf32>,
    %c0_8 = arith.constant 0 : index
    %c0_9 = arith.constant 0 : index
    %9 = vector.load %arg1[%c0_8, %c0_9] : memref<16x256xf32, #tpu.memory_space<vmem>>, vector<16x256xf32>
    %c0_10 = arith.constant 0 : index
    %c0_11 = arith.constant 0 : index
    %10 = vector.load %arg9[%c0_10, %c0_11] : memref<40x256xf32, #tpu.memory_space<vmem>>, vector<16x256xf32>
    tpu.vector_store %arg9[%c0_10, %c0_11], %9 {strides = array<i32>} : memref<40x256xf32, #tpu.memory_space<vmem>>, vector<16x256xf32>,
    %c0_12 = arith.constant 0 : index
    %c0_13 = arith.constant 0 : index
    %11 = vector.load %arg3[%c0_12, %c0_13] : memref<144x32xf32, #tpu.memory_space<vmem>>, vector<8x32xf32>
    %12 = arith.truncf %11 : vector<8x32xf32> to vector<8x32xbf16>
    %c8 = arith.constant 8 : index
    %c0_14 = arith.constant 0 : index
    %13 = vector.load %arg3[%c8, %c0_14] : memref<144x32xf32, #tpu.memory_space<vmem>>, vector<8x32xf32>
    %14 = arith.truncf %13 : vector<8x32xf32> to vector<8x32xbf16>
    %c16_15 = arith.constant 16 : index
    %c0_16 = arith.constant 0 : index
    %15 = vector.load %arg3[%c16_15, %c0_16] : memref<144x32xf32, #tpu.memory_space<vmem>>, vector<8x32xf32>
    %16 = arith.truncf %15 : vector<8x32xf32> to vector<8x32xbf16>
    %c0_17 = arith.constant 0 : index
    %c0_18 = arith.constant 0 : index
    %17 = vector.load %arg5[%c0_17, %c0_18] : memref<80x1xf32, #tpu.memory_space<vmem>>, vector<8x1xf32>
    %c0_19 = arith.constant 0 : index
    %c0_20 = arith.constant 0 : index
    %18 = vector.load %arg9[%c0_19, %c0_20] : memref<40x256xf32, #tpu.memory_space<vmem>>, vector<32x256xf32>
    %19 = arith.truncf %18 : vector<32x256xf32> to vector<32x256xbf16>
    %c1_i32 = arith.constant 1 : i32
    %20 = tpu.dynamic_rotate %18 by %c1_i32 dim 1 : vector<32x256xf32>, i32 -> vector<32x256xf32>
    %21 = arith.truncf %20 : vector<32x256xf32> to vector<32x256xbf16>
    %c255_i32 = arith.constant 255 : i32
    %22 = tpu.dynamic_rotate %18 by %c255_i32 dim 1 : vector<32x256xf32>, i32 -> vector<32x256xf32>
    %23 = arith.truncf %22 : vector<32x256xf32> to vector<32x256xbf16>
    %cst_21 = arith.constant dense<0.000000e+00> : vector<8x256xf32>
    %24 = tpu.matmul %14, %19, %cst_21 {dimension_numbers = #tpu.dot_dimension_numbers<[1], [0], [0], [1], [0, 0, 1, 1], [], []>} : vector<8x32xbf16>, vector<32x256xbf16>, vector<8x256xf32> -> vector<8x256xf32>
    %cst_22 = arith.constant dense<0.000000e+00> : vector<8x256xf32>
    %25 = tpu.matmul %12, %21, %cst_22 {dimension_numbers = #tpu.dot_dimension_numbers<[1], [0], [0], [1], [0, 0, 1, 1], [], []>} : vector<8x32xbf16>, vector<32x256xbf16>, vector<8x256xf32> -> vector<8x256xf32>
    %26 = vector.broadcast %0 : vector<1x256xf32> to vector<8x256xf32>
    %27 = arith.mulf %25, %26 : vector<8x256xf32>
    %28 = arith.addf %24, %27 : vector<8x256xf32>
    %cst_23 = arith.constant dense<0.000000e+00> : vector<8x256xf32>
    %29 = tpu.matmul %16, %23, %cst_23 {dimension_numbers = #tpu.dot_dimension_numbers<[1], [0], [0], [1], [0, 0, 1, 1], [], []>} : vector<8x32xbf16>, vector<32x256xbf16>, vector<8x256xf32> -> vector<8x256xf32>
    %30 = vector.broadcast %3 : vector<1x256xf32> to vector<8x256xf32>
    %31 = arith.mulf %29, %30 : vector<8x256xf32>
    %32 = arith.addf %28, %31 : vector<8x256xf32>
    %33 = vector.broadcast %17 : vector<8x1xf32> to vector<8x256xf32>
    %34 = arith.addf %32, %33 : vector<8x256xf32>
    %cst_24 = arith.constant 0.000000e+00 : f32
    %35 = vector.broadcast %cst_24 : f32 to vector<8x256xf32>
    %36 = arith.cmpf oge, %34, %35 : vector<8x256xf32>
    %cst_25 = arith.constant 2.000000e-01 : f32
    %37 = vector.broadcast %cst_25 : f32 to vector<8x256xf32>
    %38 = arith.mulf %37, %34 : vector<8x256xf32>
    %39 = arith.select %36, %34, %38 : vector<8x256xi1>, vector<8x256xf32>
    %c16_26 = arith.constant 16 : index
    %c0_27 = arith.constant 0 : index
    %40 = vector.load %arg9[%c16_26, %c0_27] : memref<40x256xf32, #tpu.memory_space<vmem>>, vector<8x256xf32>
    tpu.vector_store %arg9[%c16_26, %c0_27], %39 {strides = array<i32>} : memref<40x256xf32, #tpu.memory_space<vmem>>, vector<8x256xf32>,
    %c24 = arith.constant 24 : index
    %c0_28 = arith.constant 0 : index
    %41 = vector.load %arg3[%c24, %c0_28] : memref<144x32xf32, #tpu.memory_space<vmem>>, vector<8x32xf32>
    %42 = arith.truncf %41 : vector<8x32xf32> to vector<8x32xbf16>
    %c32 = arith.constant 32 : index
    %c0_29 = arith.constant 0 : index
    %43 = vector.load %arg3[%c32, %c0_29] : memref<144x32xf32, #tpu.memory_space<vmem>>, vector<8x32xf32>
    %44 = arith.truncf %43 : vector<8x32xf32> to vector<8x32xbf16>
    %c40 = arith.constant 40 : index
    %c0_30 = arith.constant 0 : index
    %45 = vector.load %arg3[%c40, %c0_30] : memref<144x32xf32, #tpu.memory_space<vmem>>, vector<8x32xf32>
    %46 = arith.truncf %45 : vector<8x32xf32> to vector<8x32xbf16>
    %c8_31 = arith.constant 8 : index
    %c0_32 = arith.constant 0 : index
    %47 = vector.load %arg5[%c8_31, %c0_32] : memref<80x1xf32, #tpu.memory_space<vmem>>, vector<8x1xf32>
    %c0_33 = arith.constant 0 : index
    %c0_34 = arith.constant 0 : index
    %48 = vector.load %arg9[%c0_33, %c0_34] : memref<40x256xf32, #tpu.memory_space<vmem>>, vector<32x256xf32>
    %49 = arith.truncf %48 : vector<32x256xf32> to vector<32x256xbf16>
    %c2_i32 = arith.constant 2 : i32
    %50 = tpu.dynamic_rotate %48 by %c2_i32 dim 1 : vector<32x256xf32>, i32 -> vector<32x256xf32>
    %51 = arith.truncf %50 : vector<32x256xf32> to vector<32x256xbf16>
    %c254_i32 = arith.constant 254 : i32
    %52 = tpu.dynamic_rotate %48 by %c254_i32 dim 1 : vector<32x256xf32>, i32 -> vector<32x256xf32>
    %53 = arith.truncf %52 : vector<32x256xf32> to vector<32x256xbf16>
    %cst_35 = arith.constant dense<0.000000e+00> : vector<8x256xf32>
    %54 = tpu.matmul %44, %49, %cst_35 {dimension_numbers = #tpu.dot_dimension_numbers<[1], [0], [0], [1], [0, 0, 1, 1], [], []>} : vector<8x32xbf16>, vector<32x256xbf16>, vector<8x256xf32> -> vector<8x256xf32>
    %cst_36 = arith.constant dense<0.000000e+00> : vector<8x256xf32>
    %55 = tpu.matmul %42, %51, %cst_36 {dimension_numbers = #tpu.dot_dimension_numbers<[1], [0], [0], [1], [0, 0, 1, 1], [], []>} : vector<8x32xbf16>, vector<32x256xbf16>, vector<8x256xf32> -> vector<8x256xf32>
    %56 = vector.broadcast %1 : vector<1x256xf32> to vector<8x256xf32>
    %57 = arith.mulf %55, %56 : vector<8x256xf32>
    %58 = arith.addf %54, %57 : vector<8x256xf32>
    %cst_37 = arith.constant dense<0.000000e+00> : vector<8x256xf32>
    %59 = tpu.matmul %46, %53, %cst_37 {dimension_numbers = #tpu.dot_dimension_numbers<[1], [0], [0], [1], [0, 0, 1, 1], [], []>} : vector<8x32xbf16>, vector<32x256xbf16>, vector<8x256xf32> -> vector<8x256xf32>
    %60 = vector.broadcast %4 : vector<1x256xf32> to vector<8x256xf32>
    %61 = arith.mulf %59, %60 : vector<8x256xf32>
    %62 = arith.addf %58, %61 : vector<8x256xf32>
    %63 = vector.broadcast %47 : vector<8x1xf32> to vector<8x256xf32>
    %64 = arith.addf %62, %63 : vector<8x256xf32>
    %cst_38 = arith.constant 0.000000e+00 : f32
    %65 = vector.broadcast %cst_38 : f32 to vector<8x256xf32>
    %66 = arith.cmpf oge, %64, %65 : vector<8x256xf32>
    %cst_39 = arith.constant 2.000000e-01 : f32
    %67 = vector.broadcast %cst_39 : f32 to vector<8x256xf32>
    %68 = arith.mulf %67, %64 : vector<8x256xf32>
    %69 = arith.select %66, %64, %68 : vector<8x256xi1>, vector<8x256xf32>
    %c24_40 = arith.constant 24 : index
    %c0_41 = arith.constant 0 : index
    %70 = vector.load %arg9[%c24_40, %c0_41] : memref<40x256xf32, #tpu.memory_space<vmem>>, vector<8x256xf32>
    tpu.vector_store %arg9[%c24_40, %c0_41], %69 {strides = array<i32>} : memref<40x256xf32, #tpu.memory_space<vmem>>, vector<8x256xf32>,
    %c48 = arith.constant 48 : index
    %c0_42 = arith.constant 0 : index
    %71 = vector.load %arg3[%c48, %c0_42] : memref<144x32xf32, #tpu.memory_space<vmem>>, vector<8x32xf32>
    %72 = arith.truncf %71 : vector<8x32xf32> to vector<8x32xbf16>
    %c56 = arith.constant 56 : index
    %c0_43 = arith.constant 0 : index
    %73 = vector.load %arg3[%c56, %c0_43] : memref<144x32xf32, #tpu.memory_space<vmem>>, vector<8x32xf32>
    %74 = arith.truncf %73 : vector<8x32xf32> to vector<8x32xbf16>
    %c64 = arith.constant 64 : index
    %c0_44 = arith.constant 0 : index
    %75 = vector.load %arg3[%c64, %c0_44] : memref<144x32xf32, #tpu.memory_space<vmem>>, vector<8x32xf32>
    %76 = arith.truncf %75 : vector<8x32xf32> to vector<8x32xbf16>
    %c16_45 = arith.constant 16 : index
    %c0_46 = arith.constant 0 : index
    %77 = vector.load %arg5[%c16_45, %c0_46] : memref<80x1xf32, #tpu.memory_space<vmem>>, vector<8x1xf32>
    %c0_47 = arith.constant 0 : index
    %c0_48 = arith.constant 0 : index
    %78 = vector.load %arg9[%c0_47, %c0_48] : memref<40x256xf32, #tpu.memory_space<vmem>>, vector<32x256xf32>
    %79 = arith.truncf %78 : vector<32x256xf32> to vector<32x256xbf16>
    %c4_i32 = arith.constant 4 : i32
    %80 = tpu.dynamic_rotate %78 by %c4_i32 dim 1 : vector<32x256xf32>, i32 -> vector<32x256xf32>
    %81 = arith.truncf %80 : vector<32x256xf32> to vector<32x256xbf16>
    %c252_i32 = arith.constant 252 : i32
    %82 = tpu.dynamic_rotate %78 by %c252_i32 dim 1 : vector<32x256xf32>, i32 -> vector<32x256xf32>
    %83 = arith.truncf %82 : vector<32x256xf32> to vector<32x256xbf16>
    %cst_49 = arith.constant dense<0.000000e+00> : vector<8x256xf32>
    %84 = tpu.matmul %74, %79, %cst_49 {dimension_numbers = #tpu.dot_dimension_numbers<[1], [0], [0], [1], [0, 0, 1, 1], [], []>} : vector<8x32xbf16>, vector<32x256xbf16>, vector<8x256xf32> -> vector<8x256xf32>
    %cst_50 = arith.constant dense<0.000000e+00> : vector<8x256xf32>
    %85 = tpu.matmul %72, %81, %cst_50 {dimension_numbers = #tpu.dot_dimension_numbers<[1], [0], [0], [1], [0, 0, 1, 1], [], []>} : vector<8x32xbf16>, vector<32x256xbf16>, vector<8x256xf32> -> vector<8x256xf32>
    %86 = vector.broadcast %2 : vector<1x256xf32> to vector<8x256xf32>
    %87 = arith.mulf %85, %86 : vector<8x256xf32>
    %88 = arith.addf %84, %87 : vector<8x256xf32>
    %cst_51 = arith.constant dense<0.000000e+00> : vector<8x256xf32>
    %89 = tpu.matmul %76, %83, %cst_51 {dimension_numbers = #tpu.dot_dimension_numbers<[1], [0], [0], [1], [0, 0, 1, 1], [], []>} : vector<8x32xbf16>, vector<32x256xbf16>, vector<8x256xf32> -> vector<8x256xf32>
    %90 = vector.broadcast %5 : vector<1x256xf32> to vector<8x256xf32>
    %91 = arith.mulf %89, %90 : vector<8x256xf32>
    %92 = arith.addf %88, %91 : vector<8x256xf32>
    %93 = vector.broadcast %77 : vector<8x1xf32> to vector<8x256xf32>
    %94 = arith.addf %92, %93 : vector<8x256xf32>
    %cst_52 = arith.constant 0.000000e+00 : f32
    %95 = vector.broadcast %cst_52 : f32 to vector<8x256xf32>
    %96 = arith.cmpf oge, %94, %95 : vector<8x256xf32>
    %cst_53 = arith.constant 2.000000e-01 : f32
    %97 = vector.broadcast %cst_53 : f32 to vector<8x256xf32>
    %98 = arith.mulf %97, %94 : vector<8x256xf32>
    %99 = arith.select %96, %94, %98 : vector<8x256xi1>, vector<8x256xf32>
    %c32_54 = arith.constant 32 : index
    %c0_55 = arith.constant 0 : index
    %100 = vector.load %arg9[%c32_54, %c0_55] : memref<40x256xf32, #tpu.memory_space<vmem>>, vector<8x256xf32>
    tpu.vector_store %arg9[%c32_54, %c0_55], %99 {strides = array<i32>} : memref<40x256xf32, #tpu.memory_space<vmem>>, vector<8x256xf32>,
    %c0_56 = arith.constant 0 : index
    %c0_57 = arith.constant 0 : index
    %101 = vector.load %arg4[%c0_56, %c0_57] : memref<32x40xf32, #tpu.memory_space<vmem>>, vector<16x40xf32>
    %102 = arith.truncf %101 : vector<16x40xf32> to vector<16x40xbf16>
    %c48_58 = arith.constant 48 : index
    %c0_59 = arith.constant 0 : index
    %103 = vector.load %arg5[%c48_58, %c0_59] : memref<80x1xf32, #tpu.memory_space<vmem>>, vector<16x1xf32>
    %c0_60 = arith.constant 0 : index
    %c0_61 = arith.constant 0 : index
    %104 = vector.load %arg9[%c0_60, %c0_61] : memref<40x256xf32, #tpu.memory_space<vmem>>, vector<40x256xf32>
    %105 = arith.truncf %104 : vector<40x256xf32> to vector<40x256xbf16>
    %cst_62 = arith.constant dense<0.000000e+00> : vector<16x256xf32>
    %106 = tpu.matmul %102, %105, %cst_62 {dimension_numbers = #tpu.dot_dimension_numbers<[1], [0], [0], [1], [0, 0, 1, 1], [], []>} : vector<16x40xbf16>, vector<40x256xbf16>, vector<16x256xf32> -> vector<16x256xf32>
    %107 = vector.broadcast %103 : vector<16x1xf32> to vector<16x256xf32>
    %108 = arith.addf %106, %107 : vector<16x256xf32>
    %cst_63 = arith.constant 0.000000e+00 : f32
    %109 = vector.broadcast %cst_63 : f32 to vector<16x256xf32>
    %110 = arith.cmpf oge, %108, %109 : vector<16x256xf32>
    %cst_64 = arith.constant 2.000000e-01 : f32
    %111 = vector.broadcast %cst_64 : f32 to vector<16x256xf32>
    %112 = arith.mulf %111, %108 : vector<16x256xf32>
    %113 = arith.select %110, %108, %112 : vector<16x256xi1>, vector<16x256xf32>
    %c0_65 = arith.constant 0 : index
    %c0_66 = arith.constant 0 : index
    %114 = vector.load %arg9[%c0_65, %c0_66] : memref<40x256xf32, #tpu.memory_space<vmem>>, vector<16x256xf32>
    tpu.vector_store %arg9[%c0_65, %c0_66], %113 {strides = array<i32>} : memref<40x256xf32, #tpu.memory_space<vmem>>, vector<16x256xf32>,
    %c72 = arith.constant 72 : index
    %c0_67 = arith.constant 0 : index
    %115 = vector.load %arg3[%c72, %c0_67] : memref<144x32xf32, #tpu.memory_space<vmem>>, vector<8x32xf32>
    %116 = arith.truncf %115 : vector<8x32xf32> to vector<8x32xbf16>
    %c80 = arith.constant 80 : index
    %c0_68 = arith.constant 0 : index
    %117 = vector.load %arg3[%c80, %c0_68] : memref<144x32xf32, #tpu.memory_space<vmem>>, vector<8x32xf32>
    %118 = arith.truncf %117 : vector<8x32xf32> to vector<8x32xbf16>
    %c88 = arith.constant 88 : index
    %c0_69 = arith.constant 0 : index
    %119 = vector.load %arg3[%c88, %c0_69] : memref<144x32xf32, #tpu.memory_space<vmem>>, vector<8x32xf32>
    %120 = arith.truncf %119 : vector<8x32xf32> to vector<8x32xbf16>
    %c24_70 = arith.constant 24 : index
    %c0_71 = arith.constant 0 : index
    %121 = vector.load %arg5[%c24_70, %c0_71] : memref<80x1xf32, #tpu.memory_space<vmem>>, vector<8x1xf32>
    %c0_72 = arith.constant 0 : index
    %c0_73 = arith.constant 0 : index
    %122 = vector.load %arg9[%c0_72, %c0_73] : memref<40x256xf32, #tpu.memory_space<vmem>>, vector<32x256xf32>
    %123 = arith.truncf %122 : vector<32x256xf32> to vector<32x256xbf16>
    %c1_i32_74 = arith.constant 1 : i32
    %124 = tpu.dynamic_rotate %122 by %c1_i32_74 dim 1 : vector<32x256xf32>, i32 -> vector<32x256xf32>
    %125 = arith.truncf %124 : vector<32x256xf32> to vector<32x256xbf16>
    %c255_i32_75 = arith.constant 255 : i32
    %126 = tpu.dynamic_rotate %122 by %c255_i32_75 dim 1 : vector<32x256xf32>, i32 -> vector<32x256xf32>
    %127 = arith.truncf %126 : vector<32x256xf32> to vector<32x256xbf16>
    %cst_76 = arith.constant dense<0.000000e+00> : vector<8x256xf32>
    %128 = tpu.matmul %118, %123, %cst_76 {dimension_numbers = #tpu.dot_dimension_numbers<[1], [0], [0], [1], [0, 0, 1, 1], [], []>} : vector<8x32xbf16>, vector<32x256xbf16>, vector<8x256xf32> -> vector<8x256xf32>
    %cst_77 = arith.constant dense<0.000000e+00> : vector<8x256xf32>
    %129 = tpu.matmul %116, %125, %cst_77 {dimension_numbers = #tpu.dot_dimension_numbers<[1], [0], [0], [1], [0, 0, 1, 1], [], []>} : vector<8x32xbf16>, vector<32x256xbf16>, vector<8x256xf32> -> vector<8x256xf32>
    %130 = vector.broadcast %0 : vector<1x256xf32> to vector<8x256xf32>
    %131 = arith.mulf %129, %130 : vector<8x256xf32>
    %132 = arith.addf %128, %131 : vector<8x256xf32>
    %cst_78 = arith.constant dense<0.000000e+00> : vector<8x256xf32>
    %133 = tpu.matmul %120, %127, %cst_78 {dimension_numbers = #tpu.dot_dimension_numbers<[1], [0], [0], [1], [0, 0, 1, 1], [], []>} : vector<8x32xbf16>, vector<32x256xbf16>, vector<8x256xf32> -> vector<8x256xf32>
    %134 = vector.broadcast %3 : vector<1x256xf32> to vector<8x256xf32>
    %135 = arith.mulf %133, %134 : vector<8x256xf32>
    %136 = arith.addf %132, %135 : vector<8x256xf32>
    %137 = vector.broadcast %121 : vector<8x1xf32> to vector<8x256xf32>
    %138 = arith.addf %136, %137 : vector<8x256xf32>
    %cst_79 = arith.constant 0.000000e+00 : f32
    %139 = vector.broadcast %cst_79 : f32 to vector<8x256xf32>
    %140 = arith.cmpf oge, %138, %139 : vector<8x256xf32>
    %cst_80 = arith.constant 2.000000e-01 : f32
    %141 = vector.broadcast %cst_80 : f32 to vector<8x256xf32>
    %142 = arith.mulf %141, %138 : vector<8x256xf32>
    %143 = arith.select %140, %138, %142 : vector<8x256xi1>, vector<8x256xf32>
    %c16_81 = arith.constant 16 : index
    %c0_82 = arith.constant 0 : index
    %144 = vector.load %arg9[%c16_81, %c0_82] : memref<40x256xf32, #tpu.memory_space<vmem>>, vector<8x256xf32>
    tpu.vector_store %arg9[%c16_81, %c0_82], %143 {strides = array<i32>} : memref<40x256xf32, #tpu.memory_space<vmem>>, vector<8x256xf32>,
    %c96 = arith.constant 96 : index
    %c0_83 = arith.constant 0 : index
    %145 = vector.load %arg3[%c96, %c0_83] : memref<144x32xf32, #tpu.memory_space<vmem>>, vector<8x32xf32>
    %146 = arith.truncf %145 : vector<8x32xf32> to vector<8x32xbf16>
    %c104 = arith.constant 104 : index
    %c0_84 = arith.constant 0 : index
    %147 = vector.load %arg3[%c104, %c0_84] : memref<144x32xf32, #tpu.memory_space<vmem>>, vector<8x32xf32>
    %148 = arith.truncf %147 : vector<8x32xf32> to vector<8x32xbf16>
    %c112 = arith.constant 112 : index
    %c0_85 = arith.constant 0 : index
    %149 = vector.load %arg3[%c112, %c0_85] : memref<144x32xf32, #tpu.memory_space<vmem>>, vector<8x32xf32>
    %150 = arith.truncf %149 : vector<8x32xf32> to vector<8x32xbf16>
    %c32_86 = arith.constant 32 : index
    %c0_87 = arith.constant 0 : index
    %151 = vector.load %arg5[%c32_86, %c0_87] : memref<80x1xf32, #tpu.memory_space<vmem>>, vector<8x1xf32>
    %c0_88 = arith.constant 0 : index
    %c0_89 = arith.constant 0 : index
    %152 = vector.load %arg9[%c0_88, %c0_89] : memref<40x256xf32, #tpu.memory_space<vmem>>, vector<32x256xf32>
    %153 = arith.truncf %152 : vector<32x256xf32> to vector<32x256xbf16>
    %c2_i32_90 = arith.constant 2 : i32
    %154 = tpu.dynamic_rotate %152 by %c2_i32_90 dim 1 : vector<32x256xf32>, i32 -> vector<32x256xf32>
    %155 = arith.truncf %154 : vector<32x256xf32> to vector<32x256xbf16>
    %c254_i32_91 = arith.constant 254 : i32
    %156 = tpu.dynamic_rotate %152 by %c254_i32_91 dim 1 : vector<32x256xf32>, i32 -> vector<32x256xf32>
    %157 = arith.truncf %156 : vector<32x256xf32> to vector<32x256xbf16>
    %cst_92 = arith.constant dense<0.000000e+00> : vector<8x256xf32>
    %158 = tpu.matmul %148, %153, %cst_92 {dimension_numbers = #tpu.dot_dimension_numbers<[1], [0], [0], [1], [0, 0, 1, 1], [], []>} : vector<8x32xbf16>, vector<32x256xbf16>, vector<8x256xf32> -> vector<8x256xf32>
    %cst_93 = arith.constant dense<0.000000e+00> : vector<8x256xf32>
    %159 = tpu.matmul %146, %155, %cst_93 {dimension_numbers = #tpu.dot_dimension_numbers<[1], [0], [0], [1], [0, 0, 1, 1], [], []>} : vector<8x32xbf16>, vector<32x256xbf16>, vector<8x256xf32> -> vector<8x256xf32>
    %160 = vector.broadcast %1 : vector<1x256xf32> to vector<8x256xf32>
    %161 = arith.mulf %159, %160 : vector<8x256xf32>
    %162 = arith.addf %158, %161 : vector<8x256xf32>
    %cst_94 = arith.constant dense<0.000000e+00> : vector<8x256xf32>
    %163 = tpu.matmul %150, %157, %cst_94 {dimension_numbers = #tpu.dot_dimension_numbers<[1], [0], [0], [1], [0, 0, 1, 1], [], []>} : vector<8x32xbf16>, vector<32x256xbf16>, vector<8x256xf32> -> vector<8x256xf32>
    %164 = vector.broadcast %4 : vector<1x256xf32> to vector<8x256xf32>
    %165 = arith.mulf %163, %164 : vector<8x256xf32>
    %166 = arith.addf %162, %165 : vector<8x256xf32>
    %167 = vector.broadcast %151 : vector<8x1xf32> to vector<8x256xf32>
    %168 = arith.addf %166, %167 : vector<8x256xf32>
    %cst_95 = arith.constant 0.000000e+00 : f32
    %169 = vector.broadcast %cst_95 : f32 to vector<8x256xf32>
    %170 = arith.cmpf oge, %168, %169 : vector<8x256xf32>
    %cst_96 = arith.constant 2.000000e-01 : f32
    %171 = vector.broadcast %cst_96 : f32 to vector<8x256xf32>
    %172 = arith.mulf %171, %168 : vector<8x256xf32>
    %173 = arith.select %170, %168, %172 : vector<8x256xi1>, vector<8x256xf32>
    %c24_97 = arith.constant 24 : index
    %c0_98 = arith.constant 0 : index
    %174 = vector.load %arg9[%c24_97, %c0_98] : memref<40x256xf32, #tpu.memory_space<vmem>>, vector<8x256xf32>
    tpu.vector_store %arg9[%c24_97, %c0_98], %173 {strides = array<i32>} : memref<40x256xf32, #tpu.memory_space<vmem>>, vector<8x256xf32>,
    %c120 = arith.constant 120 : index
    %c0_99 = arith.constant 0 : index
    %175 = vector.load %arg3[%c120, %c0_99] : memref<144x32xf32, #tpu.memory_space<vmem>>, vector<8x32xf32>
    %176 = arith.truncf %175 : vector<8x32xf32> to vector<8x32xbf16>
    %c128 = arith.constant 128 : index
    %c0_100 = arith.constant 0 : index
    %177 = vector.load %arg3[%c128, %c0_100] : memref<144x32xf32, #tpu.memory_space<vmem>>, vector<8x32xf32>
    %178 = arith.truncf %177 : vector<8x32xf32> to vector<8x32xbf16>
    %c136 = arith.constant 136 : index
    %c0_101 = arith.constant 0 : index
    %179 = vector.load %arg3[%c136, %c0_101] : memref<144x32xf32, #tpu.memory_space<vmem>>, vector<8x32xf32>
    %180 = arith.truncf %179 : vector<8x32xf32> to vector<8x32xbf16>
    %c40_102 = arith.constant 40 : index
    %c0_103 = arith.constant 0 : index
    %181 = vector.load %arg5[%c40_102, %c0_103] : memref<80x1xf32, #tpu.memory_space<vmem>>, vector<8x1xf32>
    %c0_104 = arith.constant 0 : index
    %c0_105 = arith.constant 0 : index
    %182 = vector.load %arg9[%c0_104, %c0_105] : memref<40x256xf32, #tpu.memory_space<vmem>>, vector<32x256xf32>
    %183 = arith.truncf %182 : vector<32x256xf32> to vector<32x256xbf16>
    %c4_i32_106 = arith.constant 4 : i32
    %184 = tpu.dynamic_rotate %182 by %c4_i32_106 dim 1 : vector<32x256xf32>, i32 -> vector<32x256xf32>
    %185 = arith.truncf %184 : vector<32x256xf32> to vector<32x256xbf16>
    %c252_i32_107 = arith.constant 252 : i32
    %186 = tpu.dynamic_rotate %182 by %c252_i32_107 dim 1 : vector<32x256xf32>, i32 -> vector<32x256xf32>
    %187 = arith.truncf %186 : vector<32x256xf32> to vector<32x256xbf16>
    %cst_108 = arith.constant dense<0.000000e+00> : vector<8x256xf32>
    %188 = tpu.matmul %178, %183, %cst_108 {dimension_numbers = #tpu.dot_dimension_numbers<[1], [0], [0], [1], [0, 0, 1, 1], [], []>} : vector<8x32xbf16>, vector<32x256xbf16>, vector<8x256xf32> -> vector<8x256xf32>
    %cst_109 = arith.constant dense<0.000000e+00> : vector<8x256xf32>
    %189 = tpu.matmul %176, %185, %cst_109 {dimension_numbers = #tpu.dot_dimension_numbers<[1], [0], [0], [1], [0, 0, 1, 1], [], []>} : vector<8x32xbf16>, vector<32x256xbf16>, vector<8x256xf32> -> vector<8x256xf32>
    %190 = vector.broadcast %2 : vector<1x256xf32> to vector<8x256xf32>
    %191 = arith.mulf %189, %190 : vector<8x256xf32>
    %192 = arith.addf %188, %191 : vector<8x256xf32>
    %cst_110 = arith.constant dense<0.000000e+00> : vector<8x256xf32>
    %193 = tpu.matmul %180, %187, %cst_110 {dimension_numbers = #tpu.dot_dimension_numbers<[1], [0], [0], [1], [0, 0, 1, 1], [], []>} : vector<8x32xbf16>, vector<32x256xbf16>, vector<8x256xf32> -> vector<8x256xf32>
    %194 = vector.broadcast %5 : vector<1x256xf32> to vector<8x256xf32>
    %195 = arith.mulf %193, %194 : vector<8x256xf32>
    %196 = arith.addf %192, %195 : vector<8x256xf32>
    %197 = vector.broadcast %181 : vector<8x1xf32> to vector<8x256xf32>
    %198 = arith.addf %196, %197 : vector<8x256xf32>
    %cst_111 = arith.constant 0.000000e+00 : f32
    %199 = vector.broadcast %cst_111 : f32 to vector<8x256xf32>
    %200 = arith.cmpf oge, %198, %199 : vector<8x256xf32>
    %cst_112 = arith.constant 2.000000e-01 : f32
    %201 = vector.broadcast %cst_112 : f32 to vector<8x256xf32>
    %202 = arith.mulf %201, %198 : vector<8x256xf32>
    %203 = arith.select %200, %198, %202 : vector<8x256xi1>, vector<8x256xf32>
    %c32_113 = arith.constant 32 : index
    %c0_114 = arith.constant 0 : index
    %204 = vector.load %arg9[%c32_113, %c0_114] : memref<40x256xf32, #tpu.memory_space<vmem>>, vector<8x256xf32>
    tpu.vector_store %arg9[%c32_113, %c0_114], %203 {strides = array<i32>} : memref<40x256xf32, #tpu.memory_space<vmem>>, vector<8x256xf32>,
    %c16_115 = arith.constant 16 : index
    %c0_116 = arith.constant 0 : index
    %205 = vector.load %arg4[%c16_115, %c0_116] : memref<32x40xf32, #tpu.memory_space<vmem>>, vector<16x40xf32>
    %206 = arith.truncf %205 : vector<16x40xf32> to vector<16x40xbf16>
    %c64_117 = arith.constant 64 : index
    %c0_118 = arith.constant 0 : index
    %207 = vector.load %arg5[%c64_117, %c0_118] : memref<80x1xf32, #tpu.memory_space<vmem>>, vector<16x1xf32>
    %c0_119 = arith.constant 0 : index
    %c0_120 = arith.constant 0 : index
    %208 = vector.load %arg9[%c0_119, %c0_120] : memref<40x256xf32, #tpu.memory_space<vmem>>, vector<40x256xf32>
    %209 = arith.truncf %208 : vector<40x256xf32> to vector<40x256xbf16>
    %cst_121 = arith.constant dense<0.000000e+00> : vector<16x256xf32>
    %210 = tpu.matmul %206, %209, %cst_121 {dimension_numbers = #tpu.dot_dimension_numbers<[1], [0], [0], [1], [0, 0, 1, 1], [], []>} : vector<16x40xbf16>, vector<40x256xbf16>, vector<16x256xf32> -> vector<16x256xf32>
    %211 = vector.broadcast %207 : vector<16x1xf32> to vector<16x256xf32>
    %212 = arith.addf %210, %211 : vector<16x256xf32>
    %cst_122 = arith.constant 0.000000e+00 : f32
    %213 = vector.broadcast %cst_122 : f32 to vector<16x256xf32>
    %214 = arith.cmpf oge, %212, %213 : vector<16x256xf32>
    %cst_123 = arith.constant 2.000000e-01 : f32
    %215 = vector.broadcast %cst_123 : f32 to vector<16x256xf32>
    %216 = arith.mulf %215, %212 : vector<16x256xf32>
    %217 = arith.select %214, %212, %216 : vector<16x256xi1>, vector<16x256xf32>
    %cst_124 = arith.constant dense<0.000000e+00> : vector<2x16xf32>
    %218 = tpu.matmul %6, %217, %cst_124 {dimension_numbers = #tpu.dot_dimension_numbers<[1], [1], [0], [0], [0, 0, 1, 0], [], []>} : vector<2x256xf32>, vector<16x256xf32>, vector<2x16xf32> -> vector<2x16xf32>
    %c0_125 = arith.constant 0 : index
    %c0_126 = arith.constant 0 : index
    %219 = vector.load %arg6[%c0_125, %c0_126] : memref<17x256xf32, #tpu.memory_space<vmem>>, vector<16x256xf32>
    %cst_127 = arith.constant dense<0.000000e+00> : vector<2x256xf32>
    %220 = tpu.matmul %218, %219, %cst_127 {dimension_numbers = #tpu.dot_dimension_numbers<[1], [0], [0], [1], [0, 0, 1, 1], [], []>} : vector<2x16xf32>, vector<16x256xf32>, vector<2x256xf32> -> vector<2x256xf32>
    %c16_128 = arith.constant 16 : index
    %c0_129 = arith.constant 0 : index
    %221 = vector.load %arg6[%c16_128, %c0_129] : memref<17x256xf32, #tpu.memory_space<vmem>>, vector<1x256xf32>
    %222 = vector.broadcast %221 : vector<1x256xf32> to vector<2x256xf32>
    %223 = arith.addf %220, %222 : vector<2x256xf32>
    %224 = vector.extract_strided_slice %223 {offsets = [0, 0], sizes = [2, 128], strides = [1, 1]} : vector<2x256xf32> to vector<2x128xf32>
    %225 = vector.extract_strided_slice %223 {offsets = [0, 128], sizes = [2, 128], strides = [1, 1]} : vector<2x256xf32> to vector<2x128xf32>
    %cst_130 = arith.constant -1.000000e+01 : f32
    %cst_131 = arith.constant 1.000000e+01 : f32
    %226 = vector.broadcast %cst_130 : f32 to vector<2x128xf32>
    %227 = arith.maximumf %226, %225 : vector<2x128xf32>
    %228 = vector.broadcast %cst_131 : f32 to vector<2x128xf32>
    %229 = arith.minimumf %228, %227 : vector<2x128xf32>
    %c0_132 = arith.constant 0 : index
    %c0_133 = arith.constant 0 : index
    %c0_134 = arith.constant 0 : index
    %230 = vector.load %arg2[%c0_132, %c0_133, %c0_134] : memref<1x2x128xf32, #tpu.memory_space<vmem>>, vector<1x2x128xf32>
    %231 = vector.shape_cast %230 : vector<1x2x128xf32> to vector<2x128xf32>
    %cst_135 = arith.constant 5.000000e-01 : f32
    %232 = vector.broadcast %cst_135 : f32 to vector<2x128xf32>
    %233 = arith.mulf %232, %229 : vector<2x128xf32>
    %234 = math.exp %233 : vector<2x128xf32>
    %235 = arith.mulf %231, %234 : vector<2x128xf32>
    %236 = arith.addf %224, %235 : vector<2x128xf32>
    %cst_136 = arith.constant 5.000000e-01 : f32
    %237 = vector.broadcast %cst_136 : f32 to vector<2x128xf32>
    %238 = arith.mulf %237, %229 : vector<2x128xf32>
    %cst_137 = arith.constant -0.918938517 : f32
    %239 = vector.broadcast %cst_137 : f32 to vector<2x128xf32>
    %240 = arith.subf %239, %238 : vector<2x128xf32>
    %cst_138 = arith.constant 5.000000e-01 : f32
    %241 = vector.broadcast %cst_138 : f32 to vector<2x128xf32>
    %242 = arith.mulf %241, %231 : vector<2x128xf32>
    %243 = arith.mulf %242, %231 : vector<2x128xf32>
    %244 = arith.subf %240, %243 : vector<2x128xf32>
    %cst_139 = arith.constant dense<0.000000e+00> : vector<2xf32>
    %245 = vector.multi_reduction <add>, %244, %cst_139 [1] : vector<2x128xf32> to vector<2xf32>
    %246 = vector.shape_cast %245 : vector<2xf32> to vector<2x1xf32>
    %247 = vector.shape_cast %246 : vector<2x1xf32> to vector<2x1xf32>
    %248 = vector.broadcast %247 : vector<2x1xf32> to vector<2x128xf32>
    %249 = tpu.concatenate %224, %229, %236, %248 in 1 : vector<2x128xf32>, vector<2x128xf32>, vector<2x128xf32>, vector<2x128xf32> -> vector<2x512xf32>
    %c0_140 = arith.constant 0 : index
    %c0_141 = arith.constant 0 : index
    %c0_142 = arith.constant 0 : index
    %250 = vector.load %arg8[%c0_140, %c0_141, %c0_142] : memref<1x2x512xf32, #tpu.memory_space<vmem>>, vector<1x2x512xf32>
    %251 = vector.shape_cast %250 : vector<1x2x512xf32> to vector<2x512xf32>
    %252 = vector.shape_cast %249 : vector<2x512xf32> to vector<1x2x512xf32>
    tpu.vector_store %arg8[%c0_140, %c0_141, %c0_142], %252 {strides = array<i32>} : memref<1x2x512xf32, #tpu.memory_space<vmem>>, vector<1x2x512xf32>,
    return
  }
  func.func @transform_0(%arg0: i32) -> (i32, i32) {
    %c0_i32 = arith.constant 0 : i32
    %c0_i32_0 = arith.constant 0 : i32
    return %c0_i32, %arg0 : i32, i32
  }
  func.func @transform_1(%arg0: i32) -> (i32, i32, i32) {
    %c0_i32 = arith.constant 0 : i32
    %c0_i32_0 = arith.constant 0 : i32
    %c0_i32_1 = arith.constant 0 : i32
    return %arg0, %c0_i32, %c0_i32_0 : i32, i32, i32
  }
  func.func @transform_2(%arg0: i32) -> (i32, i32) {
    %c0_i32 = arith.constant 0 : i32
    %c0_i32_0 = arith.constant 0 : i32
    %c0_i32_1 = arith.constant 0 : i32
    return %c0_i32, %c0_i32_0 : i32, i32
  }
  func.func @transform_3(%arg0: i32) -> (i32, i32) {
    %c0_i32 = arith.constant 0 : i32
    %c0_i32_0 = arith.constant 0 : i32
    %c0_i32_1 = arith.constant 0 : i32
    return %c0_i32, %c0_i32_0 : i32, i32
  }
  func.func @transform_4(%arg0: i32) -> (i32, i32) {
    %c0_i32 = arith.constant 0 : i32
    %c0_i32_0 = arith.constant 0 : i32
    %c0_i32_1 = arith.constant 0 : i32
    return %c0_i32, %c0_i32_0 : i32, i32
  }
  func.func @transform_5(%arg0: i32) -> (i32, i32) {
    %c0_i32 = arith.constant 0 : i32
    %c0_i32_0 = arith.constant 0 : i32
    %c0_i32_1 = arith.constant 0 : i32
    return %c0_i32, %c0_i32_0 : i32, i32
  }
  func.func @transform_6(%arg0: i32) -> (i32, i32) {
    %c0_i32 = arith.constant 0 : i32
    %c0_i32_0 = arith.constant 0 : i32
    %c0_i32_1 = arith.constant 0 : i32
    return %c0_i32, %c0_i32_0 : i32, i32
  }
  func.func @transform_7(%arg0: i32) -> (i32, i32, i32) {
    %c0_i32 = arith.constant 0 : i32
    %c0_i32_0 = arith.constant 0 : i32
    %c0_i32_1 = arith.constant 0 : i32
    return %arg0, %c0_i32, %c0_i32_0 : i32, i32, i32
  }
}

</mosaic_0001>

<bundles_post_ra>
// kernel: tpu_custom_call.1
= control target key start
LH: loop header
LB: loop body
LE: loop exit
PB: predicated region body
PF: predicated region fallthrough
CT: control target
= control target key end

     0   :  { %12 = vsyncpa [#allocation5], 0  ;;  %s3488_s0 = inlined_call_operand.vmem [shape: f32[16,512], index: 0, kind: input, shape index: {}]   ;;  %s3489_s1 = inlined_call_operand.vmem [shape: f32[2,2,128], index: 1, kind: input, shape index: {}]   ;;  %s3490_s2 = inlined_call_operand.vmem [shape: f32[144,32], index: 2, kind: input, shape index: {}]   ;;  %s3491_s3 = inlined_call_operand.vmem [shape: f32[32,40], index: 3, kind: input, shape index: {}]   ;;  %s3492_s4 = inlined_call_operand.vmem [shape: f32[80,1], index: 4, kind: input, shape index: {}]   ;;  %s3493_s5 = inlined_call_operand.vmem [shape: f32[17,256], index: 5, kind: input, shape index: {}]   ;;  %s3494_s6 = inlined_call_operand.vmem [shape: f32[8,256], index: 6, kind: input, shape index: {}]   ;;  %s3495_s7 = inlined_call_operand.hbm [shape: f32[2,2,512], index: 7, kind: output, shape index: {}]  }
   0x1   :  { %14 = vsyncpa [#allocation5 + $0x1], 0  ;;  %s2748_s24 = smov 0   ;;  %s2750_s25 = smov 0  }
   0x2   :  { %s2752_s26 = smov 0   ;;  %s2754_s27 = smov 0  }
   0x3 LB: > { %s2769_s28 = sadd.s32 4294967295, %s2696_s27   ;;  %s2287_s29 = sadd.s32 4294967294, %s2696_s27   ;;  %s2696_s27 = sphi %s2754_s27, %s3501_s27   ;;  %s2692_s26 = sphi %s2752_s26, %s3500_s26   ;;  %s2688_s25 = sphi %s2750_s25, %s3499_s25   ;;  %s2684_s24 = sphi %s2748_s24, %s3498_s24  }
   0x4   : > { %s2773_s30 = sadd.s32 1, %s2696_s27   ;;  %s27_s8 = sadd.s32 1, %s2692_s26 }
   0x5   : > { %s24_s9 = ssub.s32 %s2696_s27, %s2773_s30  ;;  %p34_p0 = scmp.ne.s32.totalorder %s2692_s26, %s2688_s25 }
   0x6   : > { %p25_p1 = scmp.eq.s32.totalorder %s24_s9, 0  ;;  %p35_p2 = scmp.eq.s32.totalorder %s2696_s27, 0 }
   0x7   : > { %p195_p3 = scmp.eq.s32.totalorder %s2769_s28, 1  ;;  %p200_p4 = scmp.ne.s32.totalorder %s2688_s25, %s2684_s24 }
   0x8   : > { %s2785_s10 = scalar_select %p25_p1, %s2692_s26, %s27_s8  }
   0x9   : > { %p36_p5 = por %p35_p2, %p34_p0  ;;  %p2787_p6 = por %p195_p3, %p34_p0 }
   0xa   : > { %p201_p7 = scmp.eq.s32.totalorder %s2287_s29, 1  ;;  %p2289_p9 = scmp.ge.s32.totalorder %s2696_s27, 2 }
   0xc   : > { %p2791_p8 = por %p201_p7, %p200_p4  ;;  %232 = sbr.rel (%p2289_p9) target bundleno = 26 (0x1a), region = 36 }
  0x13   : > { %235 = sbr.rel (!%p36_p5) target bundleno = 26 (0x1a), region = 40  ;;  %s237_s13 = sand.u32 (%p36_p5), 1, %s2692_s26  }
  0x14   : > { %s2332_s14 = sshll.u32 (%p36_p5), %s2696_s27, 4  ;;  %s2290_s15 = sshll.u32 (%p36_p5), %s237_s13, 5 }
  0x15   : > { %s242_s18 = scalar_lea.vmem (%p36_p5), %s3488_s0, %s2332_s14  ;;  %s239_s19 = scalar_lea.vmem (%p36_p5), [#allocation3], %s2290_s15 }
  0x16   : > { %v255_v0 = vld [vmem:[%s242_s18] sm:$0xff] (%p36_p5)  ;;  %v257_v1 = vld [vmem:[%s242_s18 + $0x8] sm:$0xff] (%p36_p5) }
  0x17   : > { %v259_v2 = vld [vmem:[%s242_s18 + $0x20] sm:$0xff] (%p36_p5)  ;;  %256 = vst [vmem:[%s239_s19] sm:$0xff] (%p36_p5), %v255_v0  ;;  %258 = vst [vmem:[%s239_s19 + $0x8] sm:$0xff] (%p36_p5), %v257_v1  ;;  %v261_v3 = vld [vmem:[%s242_s18 + $0x28] sm:$0xff] (%p36_p5) }
  0x18   : > { %260 = vst [vmem:[%s239_s19 + $0x10] sm:$0xff] (%p36_p5), %v259_v2  ;;  %262 = vst [vmem:[%s239_s19 + $0x18] sm:$0xff] (%p36_p5), %v261_v3 }
  0x1a PF: > { %p2293_p10 = scmp.ge.s32.totalorder %s2696_s27, 1  ;;  %p274_p11 = scmp.lt.s32.totalorder %s2696_s27, 3 }
  0x1c   : > { %p275_p12 = pnand %p2293_p10, %p274_p11 }
  0x1d   : > { %s2806_s20 = sand.u32 (!%p275_p12), 1, %s2688_s25   ;;  %v2698_v7 = vmov (!%p275_p12), 0   ;;  %v351_v11 = vld [vmem:[%s3490_s2 + $0x8] sm:$0xff] (!%p275_p12)  ;;  %s2699_s8 = smov (!%p275_p12), 127   ;;  %vm428_vm0 = vcmask (!%p275_p12), 261120   ;;  %v2701_v15 = vmov (!%p275_p12), 0.0   ;;  %v384_v17 = vlaneseq (!%p275_p12) }
  0x1e   : > { %278 = sbr.rel (%p275_p12) target bundleno = 3237 (0xca5), region = 67  ;;  %s2294_s21 = sshll.u32 (!%p275_p12), %s2806_s20, 5  ;;  %521 = vmatprep.mubr.bf16.mxu1 (!%p275_p12), %v2698_v7  ;;  %464 = vmatprep.mubr.bf16.mxu0 (!%p275_p12), %v2698_v7  ;;  %v352_v14 = vpack.c.bf16 (!%p275_p12), %v351_v11, %v351_v11  ;;  %v355_v16 = vld [vmem:[%s3492_s4] sm:$0xff] (!%p275_p12)  ;;  %v353_v2 = vld [vmem:[%s3490_s2 + $0x10] sm:$0xff] (!%p275_p12)  ;;  %vm1143_vm13 = vcmask (!%p275_p12), 1043456   ;;  %vm1139_vm14 = vcmask (!%p275_p12), 326656  }
  0x1f   : > { %s283_s22 = scalar_lea.vmem (!%p275_p12), [#allocation3], %s2294_s21  ;;  %2430 = vset.pattern.permute.xlu0 (!%p275_p12), %v2698_v7  ;;  %2511 = vset.pattern.permute.xlu1 (!%p275_p12), %v2698_v7  ;;  %s2700_s9 = smov (!%p275_p12), 1   ;;  %v2848_v18 = vand.u32 (!%p275_p12), 127, %v384_v17  ;;  %v349_v60 = vld [vmem:[%s3490_s2] sm:$0xff] (!%p275_p12) }
  0x20   : > { %v341_v4 = vld [vmem:[%s283_s22] sm:$0xff] (!%p275_p12)  ;;  %v343_v5 = vld [vmem:[%s283_s22 + $0x10] sm:$0xff] (!%p275_p12)  ;;  %v342_v6 = vld [vmem:[%s283_s22 + $0x8] sm:$0xff] (!%p275_p12)  ;;  %s2702_s19 = smov (!%p275_p12), 2   ;;  %s2703_s15 = smov (!%p275_p12), 126  }
  0x21   : > { %v2811_v8 = vpack.i.bf16 (!%p275_p12), %v343_v5, %v341_v4  ;;  %v344_v9 = vld [vmem:[%s283_s22 + $0x18] sm:$0xff] (!%p275_p12)  ;;  %v2813_v10 = vpack.c.bf16 (!%p275_p12), %v343_v5, %v341_v4  ;;  %vm415_vm1 = vcmp.lt.s32.totalorder (!%p275_p12), %v2848_v18, 127  ;;  %vm386_vm2 = vcmp.lt.s32.totalorder (!%p275_p12), %v2848_v18, 1  ;;  %s2704_s29 = smov (!%p275_p12), 4   ;;  %s2705_s22 = smov (!%p275_p12), 124  }
  0x22   : > { %v2820_v12 = vpack.c.bf16 (!%p275_p12), %v344_v9, %v342_v6  ;;  %v2826_v13 = vpack.i.bf16 (!%p275_p12), %v344_v9, %v342_v6  ;;  %v350_v4 = vpack.c.bf16 (!%p275_p12), %v349_v60, %v349_v60  ;;  %v354_v6 = vpack.c.bf16 (!%p275_p12), %v353_v2, %v353_v2  ;;  %p317_p13 = scmp.lt.s32.totalorder (!%p275_p12), %s2769_s28, 1 }
  0x23   : > { %2406 = vrot.lane.b32.xlu1 (!%p275_p12), %v2811_v8, %s2699_s8  ;;  %2391 = vrot.lane.b32.xlu0 (!%p275_p12), %v2811_v8, %s2700_s9  ;;  %vm639_vm3 = vcmp.lt.s32.totalorder (!%p275_p12), %v2848_v18, 2  ;;  %vm668_vm6 = vcmp.lt.s32.totalorder (!%p275_p12), %v2848_v18, 126  ;;  %vm891_vm7 = vcmp.lt.s32.totalorder (!%p275_p12), %v2848_v18, 4  ;;  %vm920_vm10 = vcmp.lt.s32.totalorder (!%p275_p12), %v2848_v18, 124 }
  0x24   : > { %489 = vmatprep.subr.bf16.mxu1 (!%p275_p12), %v2820_v12 }
  0x25   : > { %490 = vmatpush1.bf16.msra.mxu1 %v2813_v10 }
  0x27   : > { %2411 = vrot.lane.b32.xlu1 %v2826_v13, %s2699_s8  ;;  %2396 = vrot.lane.b32.xlu0 %v2826_v13, %s2700_s9 }
  0x28   : > { %2303 = vmatmul.mubr.msk.bf16.vlgmr.msra.gmra.mrb[0].mxu1 %vm428_vm0, %v352_v14 }
  0x29   : > { %565 = vmatprep.mubr.bf16.mxu1 %v2698_v7 }
  0x2b   : > { %2416 = vrot.lane.b32.xlu1 %v2701_v15, %s2700_s9  ;;  %2401 = vrot.lane.b32.xlu0 %v2701_v15, %s2700_s9 }
  0x2f   : > { %2426 = vrot.lane.b32.xlu1 %v2701_v15, %s2699_s8  ;;  %2421 = vrot.lane.b32.xlu0 %v2701_v15, %s2699_s8 }
  0x33   : > { %591 = vperm.xlu0 %2430, %v355_v16   ;;  %2432 = vrot.lane.b32.xlu1 %v2811_v8, %s2702_s19 }
  0x37   : > { %2437 = vrot.lane.b32.xlu1 %v2826_v13, %s2702_s19 }
  0x95   : > { %v2407_v19 = vpop.permute.xlu1 %2406  ;;  %v2392_v20 = vpop.permute.xlu0 %2391 }
  0x96   : > { %v2409_v21 = vunpack.i.h.bf16 %v2407_v19  ;;  %v2408_v22 = vunpack.i.l.bf16 %v2407_v19  ;;  %v2394_v23 = vunpack.i.h.bf16 %v2392_v20  ;;  %v2393_v24 = vunpack.i.l.bf16 %v2392_v20 }
  0x97   : > { %v2901_v19 = vshrl.u32 %v384_v17, 7  ;;  %v2299_v17 = vld [vmem:[%s3494_s6 + $0x3] ss:$8 sm:$0x3] }
  0x99   : > { %v2412_v25 = vpop.permute.xlu1 %2411  ;;  %v2397_v26 = vpop.permute.xlu0 %2396 }
  0x9a   : > { %v2414_v27 = vunpack.i.h.bf16 %v2412_v25  ;;  %v2413_v28 = vunpack.i.l.bf16 %v2412_v25  ;;  %v2399_v29 = vunpack.i.h.bf16 %v2397_v26  ;;  %v2398_v30 = vunpack.i.l.bf16 %v2397_v26 }
  0x9c   : > { %v416_v31 = vsel %vm415_vm1, %v2408_v22, %v2413_v28  ;;  %v417_v32 = vsel %vm415_vm1, %v2409_v21, %v2414_v27  ;;  %v387_v33 = vsel %vm386_vm2, %v2393_v24, %v2398_v30  ;;  %v388_v34 = vsel %vm386_vm2, %v2394_v23, %v2399_v29 }
  0x9d   : > { %v424_v35 = vpack.c.bf16 %v417_v32, %v416_v31  ;;  %v2417_v36 = vpop.permute.xlu1 %2416  ;;  %v2402_v37 = vpop.permute.xlu0 %2401  ;;  %v396_v38 = vpack.c.bf16 %v388_v34, %v387_v33  ;;  %v420_v39 = vsel %vm415_vm1, %v2413_v28, %v2408_v22  ;;  %v421_v40 = vsel %vm415_vm1, %v2414_v27, %v2409_v21 }
  0x9e   : > { %v2419_v41 = vunpack.i.h.bf16 %v2417_v36  ;;  %v2418_v42 = vunpack.i.l.bf16 %v2417_v36  ;;  %v2404_v43 = vunpack.i.h.bf16 %v2402_v37  ;;  %v2403_v44 = vunpack.i.l.bf16 %v2402_v37 }
  0x9f   : > { %432 = vmatprep.subr.bf16.mxu0 %v396_v38  ;;  %v425_v45 = vpack.c.bf16 %v421_v40, %v420_v39  ;;  %v391_v46 = vsel %vm386_vm2, %v2398_v30, %v2393_v24  ;;  %v392_v47 = vsel %vm386_vm2, %v2399_v29, %v2394_v23  ;;  %v2904_v21 = vsub.s32 0, %v2901_v19  ;;  %v322_v23 = vld [vmem:[%s3494_s6] ss:$8 sm:$0x3] }
  0xa0   : > { %v395_v48 = vpack.c.bf16 %v392_v47, %v391_v46  ;;  %v389_v49 = vsel %vm386_vm2, %v2403_v44, %v2418_v42  ;;  %v390_v50 = vsel %vm386_vm2, %v2404_v43, %v2419_v41  ;;  %v393_v51 = vsel %vm386_vm2, %v2418_v42, %v2403_v44 }
  0xa1   : > { %533 = vmatprep.subr.bf16.mxu1 %v425_v45  ;;  %v2427_v52 = vpop.permute.xlu1 %2426  ;;  %v2422_v53 = vpop.permute.xlu0 %2421  ;;  %v398_v54 = vpack.c.bf16 %v390_v50, %v389_v49  ;;  %v394_v55 = vsel %vm386_vm2, %v2419_v41, %v2404_v43  ;;  %v2907_v22 = vsub.s32 1, %v2901_v19  ;;  %v2917_v29 = vrot.slane %v322_v23, %v2904_v21 }
  0xa2   : > { %433 = vmatpush1.bf16.msra.mxu0 %v395_v48  ;;  %534 = vmatpush1.bf16.msra.mxu1 %v424_v35  ;;  %v2429_v56 = vunpack.i.h.bf16 %v2427_v52  ;;  %v2428_v57 = vunpack.i.l.bf16 %v2427_v52  ;;  %v2424_v58 = vunpack.i.h.bf16 %v2422_v53  ;;  %v2423_v59 = vunpack.i.l.bf16 %v2422_v53 }
  0xa3   : > { %434 = vmatprep.subr.bf16.mxu0 %v398_v54  ;;  %v397_v61 = vpack.c.bf16 %v394_v55, %v393_v51  ;;  %v2920_v30 = vrot.slane %v322_v23, %v2907_v22  ;;  %v2931_v35 = vrot.slane %v2299_v17, %v2904_v21  ;;  %v2934_v39 = vrot.slane %v2299_v17, %v2907_v22  ;;  %v604_v17 = vld [vmem:[%s3490_s2 + $0x18] sm:$0xff] }
  0xa4   : > { %v419_v62 = vsel %vm415_vm1, %v2424_v58, %v2429_v56  ;;  %v418_v63 = vsel %vm415_vm1, %v2423_v59, %v2428_v57  ;;  %v422_v0 = vsel %vm415_vm1, %v2428_v57, %v2423_v59  ;;  %v423_v1 = vsel %vm415_vm1, %v2429_v56, %v2424_v58 }
  0xa5   : > { %v426_v3 = vpack.c.bf16 %v419_v62, %v418_v63  ;;  %v427_v5 = vpack.c.bf16 %v423_v1, %v422_v0  ;;  %v2433_v20 = vpop.permute.xlu1 %2432  ;;  %v606_v1 = vld [vmem:[%s3490_s2 + $0x20] sm:$0xff] }
  0xa6   : > { %435 = vmatpush1.bf16.msra.mxu0 %v397_v61  ;;  %v2435_v24 = vunpack.i.h.bf16 %v2433_v20  ;;  %v2434_v25 = vunpack.i.l.bf16 %v2433_v20 }
  0xa7   : > { %535 = vmatprep.subr.bf16.mxu1 %v427_v5 }
  0xa8   : > { %536 = vmatpush1.bf16.msra.mxu1 %v426_v3  ;;  %v607_v3 = vpack.c.bf16 %v606_v1, %v606_v1  ;;  %v2297_v1 = vld [vmem:[%s3494_s6 + $0x1] ss:$8 sm:$0x3] }
  0xa9   : > { %2302 = vmatmul.mubr.msk.bf16.vlgmr.msra.gmra.mrb[0].mxu0 %vm428_vm0, %v350_v4  ;;  %741 = vmatprep.subr.bf16.mxu1 %v2820_v12  ;;  %v2438_v26 = vpop.permute.xlu1 %2437  ;;  %v610_v4 = vld [vmem:[%s3492_s4 + $0x8] sm:$0xff] }
  0xaa   : > { %716 = vmatprep.mubr.bf16.mxu0 %v2698_v7  ;;  %v2440_v27 = vunpack.i.h.bf16 %v2438_v26  ;;  %v2439_v28 = vunpack.i.l.bf16 %v2438_v26 }
  0xab   : > { %2304 = vmatmul.mubr.msk.bf16.vlgmr.msra.gmra.mrb[4].mxu1 %vm428_vm0, %v354_v6 }
  0xac   : > { %742 = vmatpush1.bf16.msra.mxu1 %v2813_v10  ;;  %773 = vmatprep.mubr.bf16.mxu1 %v2698_v7  ;;  %v644_v31 = vsel %vm639_vm3, %v2439_v28, %v2434_v25  ;;  %v645_v32 = vsel %vm639_vm3, %v2440_v27, %v2435_v24  ;;  %v640_v33 = vsel %vm639_vm3, %v2434_v25, %v2439_v28 }
  0xad   : > { %v641_v34 = vsel %vm639_vm3, %v2435_v24, %v2440_v27  ;;  %v648_v36 = vpack.c.bf16 %v645_v32, %v644_v31 }
  0xae   : > { %v649_v37 = vpack.c.bf16 %v641_v34, %v640_v33 }
  0xb0   : > { %684 = vmatprep.subr.bf16.mxu0 %v649_v37  ;;  %v605_v37 = vpack.c.bf16 %v604_v17, %v604_v17 }
  0xb1   : > { %685 = vmatpush1.bf16.msra.mxu0 %v648_v36 }
  0xb2   : > { %v592_v52 = vpop.permute.xlu0 %591 }
  0xfb   : > { %v523_v9 = vpop.f32.mrb[0].mxu1 }
  0xfc   : > { %v525_v11 = vpop.f32.mrb[1].mxu1 }
  0xfd   : > { %v527_v14 = vpop.f32.mrb[2].mxu1 }
  0xfe   : > { %v528_v16 = vpop.f32.mrb[3].mxu1 }
 0x17c   : > { %v466_v38 = vpop.f32.mrb[0].mxu0 }
 0x17d   : > { %v484_v40 = vmul.f32 %v2917_v29, %v466_v38  ;;  %v468_v41 = vpop.f32.mrb[1].mxu0 }
 0x17e   : > { %v485_v42 = vmul.f32 %v2920_v30, %v468_v41  ;;  %v470_v43 = vpop.f32.mrb[2].mxu0  ;;  %v567_v44 = vpop.f32.mrb[4].mxu1 }
 0x17f   : > { %v524_v45 = vadd.f32 %v523_v9, %v484_v40  ;;  %v471_v46 = vpop.f32.mrb[3].mxu0  ;;  %v585_v47 = vmul.f32 %v2931_v35, %v567_v44  ;;  %v569_v48 = vpop.f32.mrb[5].mxu1 }
 0x180   : > { %v526_v49 = vadd.f32 %v525_v11, %v485_v42  ;;  %v586_v50 = vmul.f32 %v2934_v39, %v569_v48  ;;  %v571_v51 = vpop.f32.mrb[6].mxu1 }
 0x181   : > { %v587_v53 = vadd.f32 %v585_v47, %v524_v45  ;;  %v572_v54 = vpop.f32.mrb[7].mxu1 }
 0x182   : > { %v588_v55 = vadd.f32 %v586_v50, %v526_v49 }
 0x183   : > { %v594_v56 = vadd.f32 %v592_v52, %v587_v53 }
 0x184   : > { %v595_v57 = vadd.f32 %v592_v52, %v588_v55  ;;  %v608_v55 = vld [vmem:[%s3490_s2 + $0x28] sm:$0xff] }
 0x185   : > { %vm596_vm4 = vcmp.ge.f32.partialorder %v594_v56, 0.0  ;;  %v598_v58 = vmul.f32 0.2, %v594_v56 }
 0x186   : > { %vm597_vm5 = vcmp.ge.f32.partialorder %v595_v57, 0.0  ;;  %v599_v59 = vmul.f32 0.2, %v595_v57 }
 0x187   : > { %v2940_v60 = vsel %vm596_vm4, %v594_v56, %v598_v58  ;;  %v609_v58 = vpack.c.bf16 %v608_v55, %v608_v55 }
 0x188   : > { %v2942_v61 = vsel %vm597_vm5, %v595_v57, %v599_v59  ;;  %v2441_v62 = vpack.i.bf16 %v2701_v15, %v2940_v60  ;;  %v621_v2 = vpack.c.bf16 %v2701_v15, %v2940_v60 }
 0x189   : > { %v2451_v63 = vpack.i.bf16 %v2701_v15, %v2942_v61  ;;  %v622_v0 = vpack.c.bf16 %v2701_v15, %v2942_v61 }
 0x18a   : > { %2442 = vrot.lane.b32.xlu0 %v2441_v62, %s2702_s19 }
 0x18b   : > { %2452 = vrot.lane.b32.xlu1 %v2451_v63, %s2702_s19  ;;  %743 = vmatprep.subr.bf16.mxu1 %v622_v0 }
 0x18c   : > { %744 = vmatpush1.bf16.msra.mxu1 %v621_v2  ;;  %v3013_v2 = vrot.slane %v2297_v1, %v2904_v21 }
 0x18e   : > { %2447 = vrot.lane.b32.xlu0 %v2811_v8, %s2703_s15 }
 0x18f   : > { %2457 = vrot.lane.b32.xlu1 %v2826_v13, %s2703_s15  ;;  %2306 = vmatmul.mubr.msk.bf16.vlgmr.msra.gmra.mrb[8].mxu1 %vm428_vm0, %v607_v3  ;;  %v3016_v3 = vrot.slane %v2297_v1, %v2907_v22 }
 0x190   : > { %968 = vmatprep.mubr.bf16.mxu1 %v2698_v7 }
 0x192   : > { %2462 = vrot.lane.b32.xlu0 %v2441_v62, %s2703_s15 }
 0x193   : > { %2467 = vrot.lane.b32.xlu1 %v2451_v63, %s2703_s15 }
 0x196   : > { %843 = vperm.xlu0 %2430, %v610_v4  }
 0x197   : > { %2472 = vrot.lane.b32.xlu1 %v2811_v8, %s2704_s29 }
 0x19a   : > { %2477 = vrot.lane.b32.xlu0 %v2826_v13, %s2704_s29 }
 0x1fc   : > { %v2443_v5 = vpop.permute.xlu0 %2442 }
 0x1fd   : > { %v2445_v6 = vunpack.i.h.bf16 %v2443_v5  ;;  %v2444_v9 = vunpack.i.l.bf16 %v2443_v5  ;;  %v2453_v11 = vpop.permute.xlu1 %2452 }
 0x1fe   : > { %v2455_v14 = vunpack.i.h.bf16 %v2453_v11  ;;  %v2454_v16 = vunpack.i.l.bf16 %v2453_v11 }
 0x200   : > { %v646_v20 = vsel %vm639_vm3, %v2454_v16, %v2444_v9  ;;  %v647_v23 = vsel %vm639_vm3, %v2455_v14, %v2445_v6  ;;  %v2448_v24 = vpop.permute.xlu0 %2447  ;;  %v642_v25 = vsel %vm639_vm3, %v2444_v9, %v2454_v16  ;;  %v643_v26 = vsel %vm639_vm3, %v2445_v6, %v2455_v14  ;;  %v2300_v16 = vld [vmem:[%s3494_s6 + $0x4] ss:$8 sm:$0x3] }
 0x201   : > { %v650_v27 = vpack.c.bf16 %v647_v23, %v646_v20  ;;  %v2450_v28 = vunpack.i.h.bf16 %v2448_v24  ;;  %v2449_v31 = vunpack.i.l.bf16 %v2448_v24  ;;  %v2458_v32 = vpop.permute.xlu1 %2457  ;;  %v651_v33 = vpack.c.bf16 %v643_v26, %v642_v25 }
 0x202   : > { %v2460_v34 = vunpack.i.h.bf16 %v2458_v32  ;;  %v2459_v36 = vunpack.i.l.bf16 %v2458_v32  ;;  %v3024_v25 = vrot.slane %v2300_v16, %v2904_v21  ;;  %v3027_v26 = vrot.slane %v2300_v16, %v2907_v22  ;;  %v856_v16 = vld [vmem:[%s3490_s2 + $0x30] sm:$0xff] }
 0x203   : > { %686 = vmatprep.subr.bf16.mxu0 %v651_v33 }
 0x204   : > { %v669_v38 = vsel %vm668_vm6, %v2449_v31, %v2459_v36  ;;  %v670_v40 = vsel %vm668_vm6, %v2450_v28, %v2460_v34  ;;  %v2463_v41 = vpop.permute.xlu0 %2462  ;;  %687 = vmatpush1.bf16.msra.mxu0 %v650_v27  ;;  %v673_v42 = vsel %vm668_vm6, %v2459_v36, %v2449_v31  ;;  %v674_v43 = vsel %vm668_vm6, %v2460_v34, %v2450_v28 }
 0x205   : > { %v677_v44 = vpack.c.bf16 %v670_v40, %v669_v38  ;;  %v2465_v45 = vunpack.i.h.bf16 %v2463_v41  ;;  %v2464_v46 = vunpack.i.l.bf16 %v2463_v41  ;;  %v2468_v47 = vpop.permute.xlu1 %2467  ;;  %v678_v48 = vpack.c.bf16 %v674_v43, %v673_v42 }
 0x206   : > { %v2470_v49 = vunpack.i.h.bf16 %v2468_v47  ;;  %v2469_v50 = vunpack.i.l.bf16 %v2468_v47 }
 0x207   : > { %2305 = vmatmul.mubr.msk.bf16.vlgmr.msra.gmra.mrb[4].mxu0 %vm428_vm0, %v605_v37  ;;  %785 = vmatprep.subr.bf16.mxu0 %v678_v48 }
 0x208   : > { %v671_v51 = vsel %vm668_vm6, %v2464_v46, %v2469_v50  ;;  %v672_v52 = vsel %vm668_vm6, %v2465_v45, %v2470_v49  ;;  %786 = vmatpush1.bf16.msra.mxu0 %v677_v44  ;;  %v675_v53 = vsel %vm668_vm6, %v2469_v50, %v2464_v46  ;;  %v676_v54 = vsel %vm668_vm6, %v2470_v49, %v2465_v45 }
 0x209   : > { %v679_v56 = vpack.c.bf16 %v672_v52, %v671_v51  ;;  %v680_v57 = vpack.c.bf16 %v676_v54, %v675_v53  ;;  %817 = vmatprep.mubr.bf16.mxu0 %v2698_v7  ;;  %v2473_v17 = vpop.permute.xlu1 %2472 }
 0x20a   : > { %v2475_v28 = vunpack.i.h.bf16 %v2473_v17  ;;  %v2474_v31 = vunpack.i.l.bf16 %v2473_v17 }
 0x20b   : > { %787 = vmatprep.subr.bf16.mxu0 %v680_v57  ;;  %v858_v57 = vld [vmem:[%s3490_s2 + $0x38] sm:$0xff] }
 0x20c   : > { %788 = vmatpush1.bf16.msra.mxu0 %v679_v56 }
 0x20d   : > { %993 = vmatprep.subr.bf16.mxu0 %v2820_v12 }
 0x20f   : > { %2307 = vmatmul.mubr.msk.bf16.vlgmr.msra.gmra.mrb[8].mxu0 %vm428_vm0, %v609_v58 }
 0x210   : > { %994 = vmatpush1.bf16.msra.mxu0 %v2813_v10  ;;  %1025 = vmatprep.mubr.bf16.mxu0 %v2698_v7 }
 0x215   : > { %v844_v5 = vpop.permute.xlu0 %843 }
 0x219   : > { %v2478_v27 = vpop.permute.xlu0 %2477 }
 0x21a   : > { %v2480_v32 = vunpack.i.h.bf16 %v2478_v27  ;;  %v2479_v33 = vunpack.i.l.bf16 %v2478_v27 }
 0x21c   : > { %v897_v36 = vsel %vm891_vm7, %v2480_v32, %v2475_v28  ;;  %v896_v37 = vsel %vm891_vm7, %v2479_v33, %v2474_v31  ;;  %v892_v38 = vsel %vm891_vm7, %v2474_v31, %v2479_v33  ;;  %v893_v40 = vsel %vm891_vm7, %v2475_v28, %v2480_v32 }
 0x21d   : > { %v900_v43 = vpack.c.bf16 %v897_v36, %v896_v37  ;;  %v901_v44 = vpack.c.bf16 %v893_v40, %v892_v38  ;;  %v857_v32 = vpack.c.bf16 %v856_v16, %v856_v16 }
 0x21f   : > { %936 = vmatprep.subr.bf16.mxu1 %v901_v44 }
 0x220   : > { %937 = vmatpush1.bf16.msra.mxu1 %v900_v43 }
 0x262   : > { %v775_v59 = vpop.f32.mrb[8].mxu1 }
 0x263   : > { %v777_v62 = vpop.f32.mrb[9].mxu1 }
 0x264   : > { %v779_v63 = vpop.f32.mrb[10].mxu1 }
 0x265   : > { %v780_v0 = vpop.f32.mrb[11].mxu1  ;;  %v859_v63 = vpack.c.bf16 %v858_v57, %v858_v57 }
 0x2da   : > { %v718_v4 = vpop.f32.mrb[4].mxu0 }
 0x2db   : > { %v736_v6 = vmul.f32 %v3013_v2, %v718_v4  ;;  %v720_v9 = vpop.f32.mrb[5].mxu0 }
 0x2dc   : > { %v737_v11 = vmul.f32 %v3016_v3, %v720_v9  ;;  %v722_v14 = vpop.f32.mrb[6].mxu0 }
 0x2dd   : > { %v776_v20 = vadd.f32 %v775_v59, %v736_v6  ;;  %v723_v23 = vpop.f32.mrb[7].mxu0 }
 0x2de   : > { %v778_v24 = vadd.f32 %v777_v62, %v737_v11 }
 0x2e2   : > { %v819_v34 = vpop.f32.mrb[8].mxu0 }
 0x2e3   : > { %v837_v41 = vmul.f32 %v3024_v25, %v819_v34  ;;  %v821_v42 = vpop.f32.mrb[9].mxu0 }
 0x2e4   : > { %v838_v45 = vmul.f32 %v3027_v26, %v821_v42  ;;  %v823_v46 = vpop.f32.mrb[10].mxu0 }
 0x2e5   : > { %v839_v47 = vadd.f32 %v837_v41, %v776_v20  ;;  %v824_v48 = vpop.f32.mrb[11].mxu0 }
 0x2e6   : > { %v840_v49 = vadd.f32 %v838_v45, %v778_v24 }
 0x2e7   : > { %v846_v50 = vadd.f32 %v844_v5, %v839_v47 }
 0x2e8   : > { %v847_v51 = vadd.f32 %v844_v5, %v840_v49 }
 0x2e9   : > { %vm848_vm8 = vcmp.ge.f32.partialorder %v846_v50, 0.0  ;;  %v850_v52 = vmul.f32 0.2, %v846_v50 }
 0x2ea   : > { %vm849_vm9 = vcmp.ge.f32.partialorder %v847_v51, 0.0  ;;  %v851_v53 = vmul.f32 0.2, %v847_v51 }
 0x2eb   : > { %v3040_v54 = vsel %vm848_vm8, %v846_v50, %v850_v52 }
 0x2ec   : > { %v3042_v55 = vsel %vm849_vm9, %v847_v51, %v851_v53  ;;  %v3046_v56 = vpack.i.bf16 %v3040_v54, %v2940_v60  ;;  %v3063_v62 = vpack.c.bf16 %v3040_v54, %v2940_v60  ;;  %v860_v51 = vld [vmem:[%s3490_s2 + $0x40] sm:$0xff] }
 0x2ed   : > { %v3053_v58 = vpack.i.bf16 %v3042_v55, %v2942_v61  ;;  %v3057_v59 = vpack.c.bf16 %v3042_v55, %v2942_v61  ;;  %v861_v57 = vpack.c.bf16 %v860_v51, %v860_v51 }
 0x2ee   : > { %2482 = vrot.lane.b32.xlu1 %v3046_v56, %s2704_s29 }
 0x2ef   : > { %2492 = vrot.lane.b32.xlu0 %v3053_v58, %s2704_s29  ;;  %995 = vmatprep.subr.bf16.mxu0 %v3057_v59 }
 0x2f0   : > { %996 = vmatpush1.bf16.msra.mxu0 %v3063_v62 }
 0x2f1   : > { %1150 = vmatprep.subr.bf16.mxu0 %v2820_v12  ;;  %v1112_v12 = vld [vmem:[%s3492_s4 + $0x38] sm:$0xff] }
 0x2f2   : > { %2487 = vrot.lane.b32.xlu1 %v2811_v8, %s2705_s22  ;;  %v1111_v8 = vld [vmem:[%s3492_s4 + $0x30] sm:$0xff] }
 0x2f3   : > { %2497 = vrot.lane.b32.xlu0 %v2826_v13, %s2705_s22  ;;  %2309 = vmatmul.mubr.msk.bf16.vlgmr.msra.gmra.mrb[12].mxu0 %vm428_vm0, %v859_v63 }
 0x2f4   : > { %1151 = vmatpush1.bf16.msra.mxu0 %v2813_v10  ;;  %1182 = vmatprep.mubr.bf16.mxu0 %v2698_v7  ;;  %v862_v10 = vld [vmem:[%s3492_s4 + $0x10] sm:$0xff] }
 0x2f5   : > { %1152 = vmatprep.subr.bf16.mxu0 %v3057_v59 }
 0x2f6   : > { %2502 = vrot.lane.b32.xlu1 %v3046_v56, %s2705_s22 }
 0x2f7   : > { %2507 = vrot.lane.b32.xlu0 %v3053_v58, %s2705_s22 }
 0x2f8   : > { %1153 = vmatpush1.bf16.msra.mxu0 %v3063_v62 }
 0x2fa   : > { %1095 = vperm.xlu1 %2511, %v862_v10  }
 0x2fb   : > { %1131 = vperm.xlu0 %2430, %v1111_v8  }
 0x2fe   : > { %1136 = vperm.xlu1 %2511, %v1112_v12  }
 0x360   : > { %v2483_v13 = vpop.permute.xlu1 %2482 }
 0x361   : > { %v2485_v60 = vunpack.i.h.bf16 %v2483_v13  ;;  %v2484_v61 = vunpack.i.l.bf16 %v2483_v13  ;;  %v2493_v0 = vpop.permute.xlu0 %2492  ;;  %v2298_v13 = vld [vmem:[%s3494_s6 + $0x2] ss:$8 sm:$0x3] }
 0x362   : > { %v2495_v1 = vunpack.i.h.bf16 %v2493_v0  ;;  %v2494_v4 = vunpack.i.l.bf16 %v2493_v0 }
 0x364   : > { %v898_v5 = vsel %vm891_vm7, %v2494_v4, %v2484_v61  ;;  %v899_v6 = vsel %vm891_vm7, %v2495_v1, %v2485_v60  ;;  %v2488_v9 = vpop.permute.xlu1 %2487  ;;  %v894_v11 = vsel %vm891_vm7, %v2484_v61, %v2494_v4  ;;  %v895_v14 = vsel %vm891_vm7, %v2485_v60, %v2495_v1 }
 0x365   : > { %v902_v20 = vpack.c.bf16 %v899_v6, %v898_v5  ;;  %v2490_v23 = vunpack.i.h.bf16 %v2488_v9  ;;  %v2489_v24 = vunpack.i.l.bf16 %v2488_v9  ;;  %v2498_v17 = vpop.permute.xlu0 %2497  ;;  %v903_v27 = vpack.c.bf16 %v895_v14, %v894_v11  ;;  %v2301_v9 = vld [vmem:[%s3494_s6 + $0x5] ss:$8 sm:$0x3] }
 0x366   : > { %v2500_v28 = vunpack.i.h.bf16 %v2498_v17  ;;  %v2499_v31 = vunpack.i.l.bf16 %v2498_v17  ;;  %v3131_v60 = vrot.slane %v2298_v13, %v2904_v21  ;;  %v3134_v61 = vrot.slane %v2298_v13, %v2907_v22 }
 0x367   : > { %938 = vmatprep.subr.bf16.mxu1 %v903_v27 }
 0x368   : > { %v921_v33 = vsel %vm920_vm10, %v2489_v24, %v2499_v31  ;;  %v922_v34 = vsel %vm920_vm10, %v2490_v23, %v2500_v28  ;;  %v2503_v36 = vpop.permute.xlu1 %2502  ;;  %939 = vmatpush1.bf16.msra.mxu1 %v902_v20  ;;  %v925_v37 = vsel %vm920_vm10, %v2499_v31, %v2489_v24  ;;  %v926_v38 = vsel %vm920_vm10, %v2500_v28, %v2490_v23 }
 0x369   : > { %v929_v40 = vpack.c.bf16 %v922_v34, %v921_v33  ;;  %v2505_v41 = vunpack.i.h.bf16 %v2503_v36  ;;  %v2504_v42 = vunpack.i.l.bf16 %v2503_v36  ;;  %v2508_v43 = vpop.permute.xlu0 %2507  ;;  %v930_v44 = vpack.c.bf16 %v926_v38, %v925_v37 }
 0x36a   : > { %v2510_v45 = vunpack.i.h.bf16 %v2508_v43  ;;  %v2509_v46 = vunpack.i.l.bf16 %v2508_v43  ;;  %v3142_v20 = vrot.slane %v2301_v9, %v2904_v21  ;;  %v3145_v23 = vrot.slane %v2301_v9, %v2907_v22 }
 0x36b   : > { %2308 = vmatmul.mubr.msk.bf16.vlgmr.msra.gmra.mrb[12].mxu1 %vm428_vm0, %v857_v32  ;;  %1037 = vmatprep.subr.bf16.mxu1 %v930_v44 }
 0x36c   : > { %v923_v47 = vsel %vm920_vm10, %v2504_v42, %v2509_v46  ;;  %v924_v48 = vsel %vm920_vm10, %v2505_v41, %v2510_v45  ;;  %1038 = vmatpush1.bf16.msra.mxu1 %v929_v40  ;;  %v927_v49 = vsel %vm920_vm10, %v2509_v46, %v2504_v42  ;;  %v928_v50 = vsel %vm920_vm10, %v2510_v45, %v2505_v41  ;;  %v1108_v45 = vld [vmem:[%s3491_s3] sm:$0xff]  ;;  %v1109_v46 = vld [vmem:[%s3491_s3 + $0x8] sm:$0xff] }
 0x36d   : > { %v931_v52 = vpack.c.bf16 %v924_v48, %v923_v47  ;;  %v932_v53 = vpack.c.bf16 %v928_v50, %v927_v49  ;;  %1069 = vmatprep.mubr.bf16.mxu1 %v2698_v7  ;;  %v1110_v49 = vpack.c.bf16 %v1109_v46, %v1108_v45 }
 0x36f   : > { %1039 = vmatprep.subr.bf16.mxu1 %v932_v53 }
 0x370   : > { %1040 = vmatpush1.bf16.msra.mxu1 %v931_v52 }
 0x373   : > { %2310 = vmatmul.mubr.msk.bf16.vlgmr.msra.gmra.mrb[16].mxu1 %vm428_vm0, %v861_v57 }
 0x374   : > { %1319 = vmatprep.mubr.bf16.mxu1 %v2698_v7 }
 0x379   : > { %v1096_v34 = vpop.permute.xlu1 %1095 }
 0x37a   : > { %v1132_v50 = vpop.permute.xlu0 %1131 }
 0x37d   : > { %v1137_v57 = vpop.permute.xlu1 %1136 }
 0x3c6   : > { %v1027_v63 = vpop.f32.mrb[12].mxu0 }
 0x3c7   : > { %v1029_v8 = vpop.f32.mrb[13].mxu0 }
 0x3c8   : > { %v1031_v10 = vpop.f32.mrb[14].mxu0 }
 0x3c9   : > { %v1032_v12 = vpop.f32.mrb[15].mxu0 }
 0x43e   : > { %v970_v0 = vpop.f32.mrb[12].mxu1 }
 0x43f   : > { %v988_v1 = vmul.f32 %v3131_v60, %v970_v0  ;;  %v972_v4 = vpop.f32.mrb[13].mxu1 }
 0x440   : > { %v989_v5 = vmul.f32 %v3134_v61, %v972_v4  ;;  %v974_v6 = vpop.f32.mrb[14].mxu1 }
 0x441   : > { %v1028_v11 = vadd.f32 %v1027_v63, %v988_v1  ;;  %v975_v14 = vpop.f32.mrb[15].mxu1 }
 0x442   : > { %v1030_v16 = vadd.f32 %v1029_v8, %v989_v5 }
 0x446   : > { %v1071_v24 = vpop.f32.mrb[16].mxu1 }
 0x447   : > { %v1089_v17 = vmul.f32 %v3142_v20, %v1071_v24  ;;  %v1073_v27 = vpop.f32.mrb[17].mxu1 }
 0x448   : > { %v1090_v28 = vmul.f32 %v3145_v23, %v1073_v27  ;;  %v1075_v31 = vpop.f32.mrb[18].mxu1 }
 0x449   : > { %v1091_v32 = vadd.f32 %v1089_v17, %v1028_v11  ;;  %v1076_v33 = vpop.f32.mrb[19].mxu1 }
 0x44a   : > { %v1092_v36 = vadd.f32 %v1090_v28, %v1030_v16  ;;  %v1211_v28 = vld [vmem:[%s3490_s2 + $0x50] sm:$0xff] }
 0x44b   : > { %v1098_v37 = vadd.f32 %v1096_v34, %v1091_v32  ;;  %v1212_v31 = vpack.c.bf16 %v1211_v28, %v1211_v28 }
 0x44c   : > { %v1099_v38 = vadd.f32 %v1096_v34, %v1092_v36 }
 0x44d   : > { %vm1100_vm11 = vcmp.ge.f32.partialorder %v1098_v37, 0.0  ;;  %v1102_v40 = vmul.f32 0.2, %v1098_v37 }
 0x44e   : > { %vm1101_vm12 = vcmp.ge.f32.partialorder %v1099_v38, 0.0  ;;  %v1103_v41 = vmul.f32 0.2, %v1099_v38 }
 0x44f   : > { %v1104_v42 = vsel %vm1100_vm11, %v1098_v37, %v1102_v40 }
 0x450   : > { %v1105_v43 = vsel %vm1101_vm12, %v1099_v38, %v1103_v41  ;;  %v1127_v44 = vpack.c.bf16 %v1104_v42, %v1104_v42 }
 0x451   : > { %v1128_v47 = vpack.c.bf16 %v1105_v43, %v1105_v43 }
 0x452   : > { %v1145_v48 = vsel %vm1143_vm13, %v1127_v44, 0 }
 0x453   : > { %2311 = vmatprep.subr.msk.bf16.mxu0 %vm1143_vm13, %v1128_v47 }
 0x454   : > { %1155 = vmatpush1.bf16.msra.mxu0 %v1145_v48 }
 0x457   : > { %2312 = vmatmul.mubr.msk.bf16.vlgmr.msra.gmra.mrb[16].mxu0 %vm1139_vm14, %v1110_v49 }
 0x458   : > { %1365 = vmatprep.mubr.bf16.mxu0 %v2698_v7 }
 0x52a   : > { %v1184_v51 = vpop.f32.mrb[16].mxu0 }
 0x52b   : > { %v1185_v52 = vadd.f32 %v1184_v51, %v1132_v50  ;;  %v1186_v53 = vpop.f32.mrb[17].mxu0 }
 0x52c   : > { %v1187_v63 = vadd.f32 %v1186_v53, %v1132_v50  ;;  %v1188_v8 = vpop.f32.mrb[18].mxu0 }
 0x52d   : > { %v1197_v10 = vmul.f32 0.2, %v1185_v52  ;;  %v1189_v12 = vadd.f32 %v1188_v8, %v1137_v57  ;;  %v1190_v13 = vpop.f32.mrb[19].mxu0  ;;  %vm1193_vm15 = vcmp.ge.f32.partialorder %v1185_v52, 0.0 }
 0x52e   : > { %vm1194_vm4 = vcmp.ge.f32.partialorder %v1187_v63, 0.0  ;;  %v1198_v0 = vmul.f32 0.2, %v1187_v63  ;;  %v1191_v1 = vadd.f32 %v1190_v13, %v1137_v57  ;;  %v1209_v57 = vld [vmem:[%s3490_s2 + $0x48] sm:$0xff] }
 0x52f   : > { %vm1195_vm5 = vcmp.ge.f32.partialorder %v1189_v12, 0.0  ;;  %v1199_v4 = vmul.f32 0.2, %v1189_v12  ;;  %v1201_v6 = vsel %vm1193_vm15, %v1185_v52, %v1197_v10 }
 0x530   : > { %vm1196_vm8 = vcmp.ge.f32.partialorder %v1191_v1, 0.0  ;;  %v1200_v5 = vmul.f32 0.2, %v1191_v1  ;;  %v1202_v9 = vsel %vm1194_vm4, %v1187_v63, %v1198_v0 }
 0x531   : > { %v1203_v11 = vsel %vm1195_vm5, %v1189_v12, %v1199_v4  ;;  %v1210_v4 = vpack.c.bf16 %v1209_v57, %v1209_v57 }
 0x532   : > { %v1204_v14 = vsel %vm1196_vm8, %v1191_v1, %v1200_v5  ;;  %v3159_v16 = vpack.i.bf16 %v1203_v11, %v1201_v6  ;;  %v3161_v24 = vpack.c.bf16 %v1203_v11, %v1201_v6 }
 0x533   : > { %v3163_v17 = vpack.i.bf16 %v1204_v14, %v1202_v9  ;;  %v3165_v27 = vpack.c.bf16 %v1204_v14, %v1202_v9 }
 0x534   : > { %2513 = vrot.lane.b32.xlu0 %v3159_v16, %s2700_s9 }
 0x535   : > { %2523 = vrot.lane.b32.xlu1 %v3163_v17, %s2700_s9  ;;  %1333 = vmatprep.subr.bf16.mxu0 %v3165_v27 }
 0x536   : > { %1334 = vmatpush1.bf16.msra.mxu0 %v3161_v24 }
 0x537   : > { %1335 = vmatprep.subr.bf16.mxu0 %v3057_v59  ;;  %v1215_v59 = vld [vmem:[%s3492_s4 + $0x18] sm:$0xff] }
 0x538   : > { %2518 = vrot.lane.b32.xlu0 %v3046_v56, %s2700_s9 }
 0x539   : > { %2528 = vrot.lane.b32.xlu1 %v3053_v58, %s2700_s9 }
 0x53a   : > { %1336 = vmatpush1.bf16.msra.mxu0 %v3063_v62 }
 0x53c   : > { %2533 = vrot.lane.b32.xlu0 %v3159_v16, %s2699_s8 }
 0x53d   : > { %2543 = vrot.lane.b32.xlu1 %v3163_v17, %s2699_s8  ;;  %2314 = vmatmul.mubr.msk.bf16.vlgmr.msra.gmra.mrb[20].mxu0 %vm428_vm0, %v1212_v31 }
 0x53e   : > { %1547 = vmatprep.mubr.bf16.mxu0 %v2698_v7 }
 0x540   : > { %2538 = vrot.lane.b32.xlu0 %v3046_v56, %s2699_s8 }
 0x541   : > { %2548 = vrot.lane.b32.xlu1 %v3053_v58, %s2699_s8 }
 0x544   : > { %1424 = vperm.xlu0 %2430, %v1215_v59  }
 0x545   : > { %2553 = vrot.lane.b32.xlu1 %v3159_v16, %s2702_s19 }
 0x548   : > { %2558 = vrot.lane.b32.xlu0 %v3163_v17, %s2702_s19 }
 0x5a6   : > { %v2514_v62 = vpop.permute.xlu0 %2513 }
 0x5a7   : > { %v2516_v32 = vunpack.i.h.bf16 %v2514_v62  ;;  %v2515_v33 = vunpack.i.l.bf16 %v2514_v62  ;;  %v2524_v34 = vpop.permute.xlu1 %2523 }
 0x5a8   : > { %v2526_v36 = vunpack.i.h.bf16 %v2524_v34  ;;  %v2525_v56 = vunpack.i.l.bf16 %v2524_v34 }
 0x5aa   : > { %v1248_v58 = vsel %vm386_vm2, %v2525_v56, %v2515_v33  ;;  %v1249_v37 = vsel %vm386_vm2, %v2526_v36, %v2516_v32  ;;  %v2519_v38 = vpop.permute.xlu0 %2518  ;;  %v1244_v40 = vsel %vm386_vm2, %v2515_v33, %v2525_v56  ;;  %v1245_v41 = vsel %vm386_vm2, %v2516_v32, %v2526_v36 }
 0x5ab   : > { %v1252_v42 = vpack.c.bf16 %v1249_v37, %v1248_v58  ;;  %v2521_v43 = vunpack.i.h.bf16 %v2519_v38  ;;  %v2520_v44 = vunpack.i.l.bf16 %v2519_v38  ;;  %v2529_v45 = vpop.permute.xlu1 %2528  ;;  %v1253_v46 = vpack.c.bf16 %v1245_v41, %v1244_v40  ;;  %v1213_v38 = vld [vmem:[%s3490_s2 + $0x58] sm:$0xff] }
 0x5ac   : > { %v2531_v47 = vunpack.i.h.bf16 %v2529_v45  ;;  %v2530_v48 = vunpack.i.l.bf16 %v2529_v45 }
 0x5ad   : > { %1287 = vmatprep.subr.bf16.mxu1 %v1253_v46 }
 0x5ae   : > { %v1250_v49 = vsel %vm386_vm2, %v2530_v48, %v2520_v44  ;;  %v1251_v50 = vsel %vm386_vm2, %v2531_v47, %v2521_v43  ;;  %v2534_v51 = vpop.permute.xlu0 %2533  ;;  %1288 = vmatpush1.bf16.msra.mxu1 %v1252_v42  ;;  %v1246_v52 = vsel %vm386_vm2, %v2520_v44, %v2530_v48  ;;  %v1247_v53 = vsel %vm386_vm2, %v2521_v43, %v2531_v47 }
 0x5af   : > { %v1254_v63 = vpack.c.bf16 %v1251_v50, %v1250_v49  ;;  %v2536_v8 = vunpack.i.h.bf16 %v2534_v51  ;;  %v2535_v10 = vunpack.i.l.bf16 %v2534_v51  ;;  %v2544_v12 = vpop.permute.xlu1 %2543  ;;  %v1255_v13 = vpack.c.bf16 %v1247_v53, %v1246_v52 }
 0x5b0   : > { %v2546_v0 = vunpack.i.h.bf16 %v2544_v12  ;;  %v2545_v1 = vunpack.i.l.bf16 %v2544_v12  ;;  %v1214_v42 = vpack.c.bf16 %v1213_v38, %v1213_v38 }
 0x5b1   : > { %1289 = vmatprep.subr.bf16.mxu1 %v1255_v13 }
 0x5b2   : > { %v1272_v5 = vsel %vm415_vm1, %v2535_v10, %v2545_v1  ;;  %v1273_v6 = vsel %vm415_vm1, %v2536_v8, %v2546_v0  ;;  %v2539_v9 = vpop.permute.xlu0 %2538  ;;  %1290 = vmatpush1.bf16.msra.mxu1 %v1254_v63  ;;  %v1276_v11 = vsel %vm415_vm1, %v2545_v1, %v2535_v10  ;;  %v1277_v14 = vsel %vm415_vm1, %v2546_v0, %v2536_v8 }
 0x5b3   : > { %v1280_v28 = vpack.c.bf16 %v1273_v6, %v1272_v5  ;;  %v2541_v31 = vunpack.i.h.bf16 %v2539_v9  ;;  %v2540_v59 = vunpack.i.l.bf16 %v2539_v9  ;;  %v2549_v62 = vpop.permute.xlu1 %2548  ;;  %v1281_v32 = vpack.c.bf16 %v1277_v14, %v1276_v11 }
 0x5b4   : > { %v2551_v33 = vunpack.i.h.bf16 %v2549_v62  ;;  %v2550_v34 = vunpack.i.l.bf16 %v2549_v62 }
 0x5b5   : > { %2313 = vmatmul.mubr.msk.bf16.vlgmr.msra.gmra.mrb[20].mxu1 %vm428_vm0, %v1210_v4  ;;  %1377 = vmatprep.subr.bf16.mxu1 %v1281_v32 }
 0x5b6   : > { %v1274_v36 = vsel %vm415_vm1, %v2540_v59, %v2550_v34  ;;  %v1275_v56 = vsel %vm415_vm1, %v2541_v31, %v2551_v33  ;;  %1378 = vmatpush1.bf16.msra.mxu1 %v1280_v28  ;;  %v1278_v58 = vsel %vm415_vm1, %v2550_v34, %v2540_v59  ;;  %v1279_v37 = vsel %vm415_vm1, %v2551_v33, %v2541_v31 }
 0x5b7   : > { %v1282_v40 = vpack.c.bf16 %v1275_v56, %v1274_v36  ;;  %v1283_v41 = vpack.c.bf16 %v1279_v37, %v1278_v58  ;;  %1409 = vmatprep.mubr.bf16.mxu1 %v2698_v7  ;;  %v2554_v44 = vpop.permute.xlu1 %2553 }
 0x5b8   : > { %v2556_v46 = vunpack.i.h.bf16 %v2554_v44  ;;  %v2555_v47 = vunpack.i.l.bf16 %v2554_v44 }
 0x5b9   : > { %1379 = vmatprep.subr.bf16.mxu1 %v1283_v41  ;;  %v1439_v41 = vld [vmem:[%s3490_s2 + $0x68] sm:$0xff] }
 0x5ba   : > { %1380 = vmatpush1.bf16.msra.mxu1 %v1282_v40 }
 0x5bb   : > { %1561 = vmatprep.subr.bf16.mxu1 %v3165_v27 }
 0x5bd   : > { %2315 = vmatmul.mubr.msk.bf16.vlgmr.msra.gmra.mrb[24].mxu1 %vm428_vm0, %v1214_v42 }
 0x5be   : > { %1562 = vmatpush1.bf16.msra.mxu1 %v3161_v24  ;;  %1593 = vmatprep.mubr.bf16.mxu1 %v2698_v7 }
 0x5c3   : > { %v1425_v43 = vpop.permute.xlu0 %1424 }
 0x5c7   : > { %v2559_v45 = vpop.permute.xlu0 %2558 }
 0x5c8   : > { %v2561_v48 = vunpack.i.h.bf16 %v2559_v45  ;;  %v2560_v49 = vunpack.i.l.bf16 %v2559_v45 }
 0x5ca   : > { %v1477_v50 = vsel %vm639_vm3, %v2561_v48, %v2556_v46  ;;  %v1476_v51 = vsel %vm639_vm3, %v2560_v49, %v2555_v47  ;;  %v1472_v52 = vsel %vm639_vm3, %v2555_v47, %v2560_v49  ;;  %v1473_v53 = vsel %vm639_vm3, %v2556_v46, %v2561_v48 }
 0x5cb   : > { %v1480_v57 = vpack.c.bf16 %v1477_v50, %v1476_v51  ;;  %v1481_v63 = vpack.c.bf16 %v1473_v53, %v1472_v52 }
 0x5cd   : > { %1515 = vmatprep.subr.bf16.mxu0 %v1481_v63 }
 0x5ce   : > { %1516 = vmatpush1.bf16.msra.mxu0 %v1480_v57  ;;  %v1437_v57 = vld [vmem:[%s3490_s2 + $0x60] sm:$0xff] }
 0x610   : > { %v1367_v8 = vpop.f32.mrb[20].mxu0 }
 0x611   : > { %v1369_v10 = vpop.f32.mrb[21].mxu0 }
 0x612   : > { %v1371_v12 = vpop.f32.mrb[22].mxu0 }
 0x613   : > { %v1372_v13 = vpop.f32.mrb[23].mxu0 }
 0x688   : > { %v1321_v0 = vpop.f32.mrb[20].mxu1 }
 0x689   : > { %v1328_v1 = vmul.f32 %v1321_v0, %v2917_v29  ;;  %v1323_v4 = vpop.f32.mrb[21].mxu1 }
 0x68a   : > { %v1329_v5 = vmul.f32 %v1323_v4, %v2920_v30  ;;  %v1325_v6 = vpop.f32.mrb[22].mxu1  ;;  %v1438_v4 = vpack.c.bf16 %v1437_v57, %v1437_v57 }
 0x68b   : > { %v1368_v9 = vadd.f32 %v1367_v8, %v1328_v1  ;;  %v1326_v11 = vpop.f32.mrb[23].mxu1 }
 0x68c   : > { %v1370_v14 = vadd.f32 %v1369_v10, %v1329_v5 }
 0x690   : > { %v1411_v28 = vpop.f32.mrb[24].mxu1 }
 0x691   : > { %v1418_v31 = vmul.f32 %v1411_v28, %v2931_v35  ;;  %v1413_v59 = vpop.f32.mrb[25].mxu1 }
 0x692   : > { %v1419_v62 = vmul.f32 %v1413_v59, %v2934_v39  ;;  %v1415_v32 = vpop.f32.mrb[26].mxu1 }
 0x693   : > { %v1420_v33 = vadd.f32 %v1418_v31, %v1368_v9  ;;  %v1416_v34 = vpop.f32.mrb[27].mxu1 }
 0x694   : > { %v1421_v36 = vadd.f32 %v1419_v62, %v1370_v14 }
 0x695   : > { %v1427_v56 = vadd.f32 %v1425_v43, %v1420_v33 }
 0x696   : > { %v1428_v58 = vadd.f32 %v1425_v43, %v1421_v36  ;;  %v1440_v43 = vpack.c.bf16 %v1439_v41, %v1439_v41 }
 0x697   : > { %vm1429_vm1 = vcmp.ge.f32.partialorder %v1427_v56, 0.0  ;;  %v1431_v29 = vmul.f32 0.2, %v1427_v56 }
 0x698   : > { %vm1430_vm2 = vcmp.ge.f32.partialorder %v1428_v58, 0.0  ;;  %v1432_v30 = vmul.f32 0.2, %v1428_v58 }
 0x699   : > { %v3255_v37 = vsel %vm1429_vm1, %v1427_v56, %v1431_v29 }
 0x69a   : > { %v3257_v38 = vsel %vm1430_vm2, %v1428_v58, %v1432_v30  ;;  %v2562_v35 = vpack.i.bf16 %v3040_v54, %v3255_v37  ;;  %v1454_v42 = vpack.c.bf16 %v3040_v54, %v3255_v37  ;;  %v1443_v54 = vld [vmem:[%s3492_s4 + $0x20] sm:$0xff]  ;;  %v1441_v30 = vld [vmem:[%s3490_s2 + $0x70] sm:$0xff] }
 0x69b   : > { %v2572_v39 = vpack.i.bf16 %v3042_v55, %v3257_v38  ;;  %v1455_v40 = vpack.c.bf16 %v3042_v55, %v3257_v38 }
 0x69c   : > { %2563 = vrot.lane.b32.xlu1 %v2562_v35, %s2702_s19 }
 0x69d   : > { %2573 = vrot.lane.b32.xlu0 %v2572_v39, %s2702_s19  ;;  %1563 = vmatprep.subr.bf16.mxu1 %v1455_v40  ;;  %v1442_v40 = vpack.c.bf16 %v1441_v30, %v1441_v30  ;;  %s2295_s19 = sshll.u32 %s2806_s20, 3 }
 0x69e   : > { %1564 = vmatpush1.bf16.msra.mxu1 %v1454_v42  ;;  %s315_s21 = scalar_lea.vmem [#allocation4], %s2295_s19 }
 0x69f   : > { %s2210_s8 = sshll.u32 %s315_s21, 4  ;;  %s3446_s8 = int_to_ptr.vmem [resolvable:$true] %s2210_s8 }
 0x6a0   : > { %2568 = vrot.lane.b32.xlu1 %v3159_v16, %s2703_s15  ;;  %s2634_s16 = scalar_lea.vmem %s3446_s8, 128 }
 0x6a1   : > { %2578 = vrot.lane.b32.xlu0 %v3163_v17, %s2703_s15  ;;  %2317 = vmatmul.mubr.msk.bf16.vlgmr.msra.gmra.mrb[28].mxu1 %vm428_vm0, %v1440_v43  ;;  %p2635_p0 = scmp.ne.s32.totalorder %s3446_s8, %s2634_s16 }
 0x6a2   : > { %1775 = vmatprep.mubr.bf16.mxu1 %v2698_v7 }
 0x6a3   : > { %p2636_p1 = pnand %p2635_p0, %p2787_p6 }
 0x6a4   : > { %2583 = vrot.lane.b32.xlu1 %v2562_v35, %s2703_s15 }
 0x6a5   : > { %2588 = vrot.lane.b32.xlu0 %v2572_v39, %s2703_s15  ;;  %s2333_s15 = sshll.u32 %s2769_s28, 7  ;;  %p2637_p2 = pneg %p2636_p1 }
 0x6a8   : > { %1652 = vperm.xlu1 %2511, %v1443_v54  }
 0x6a9   : > { %2593 = vrot.lane.b32.xlu0 %v3159_v16, %s2704_s29 }
 0x6ac   : > { %2598 = vrot.lane.b32.xlu1 %v3163_v17, %s2704_s29 }
 0x70e   : > { %v2564_v55 = vpop.permute.xlu1 %2563 }
 0x70f   : > { %v2566_v44 = vunpack.i.h.bf16 %v2564_v55  ;;  %v2565_v45 = vunpack.i.l.bf16 %v2564_v55  ;;  %v2574_v46 = vpop.permute.xlu0 %2573 }
 0x710   : > { %v2576_v47 = vunpack.i.h.bf16 %v2574_v46  ;;  %v2575_v48 = vunpack.i.l.bf16 %v2574_v46 }
 0x712   : > { %v1478_v49 = vsel %vm639_vm3, %v2575_v48, %v2565_v45  ;;  %v1479_v50 = vsel %vm639_vm3, %v2576_v47, %v2566_v44  ;;  %v2569_v51 = vpop.permute.xlu1 %2568  ;;  %v1474_v52 = vsel %vm639_vm3, %v2565_v45, %v2575_v48  ;;  %v1475_v53 = vsel %vm639_vm3, %v2566_v44, %v2576_v47 }
 0x713   : > { %v1482_v63 = vpack.c.bf16 %v1479_v50, %v1478_v49  ;;  %v2571_v8 = vunpack.i.h.bf16 %v2569_v51  ;;  %v2570_v10 = vunpack.i.l.bf16 %v2569_v51  ;;  %v2579_v12 = vpop.permute.xlu0 %2578  ;;  %v1483_v13 = vpack.c.bf16 %v1475_v53, %v1474_v52 }
 0x714   : > { %v2581_v0 = vunpack.i.h.bf16 %v2579_v12  ;;  %v2580_v1 = vunpack.i.l.bf16 %v2579_v12 }
 0x715   : > { %1517 = vmatprep.subr.bf16.mxu0 %v1483_v13 }
 0x716   : > { %v1500_v5 = vsel %vm668_vm6, %v2570_v10, %v2580_v1  ;;  %v1501_v6 = vsel %vm668_vm6, %v2571_v8, %v2581_v0  ;;  %v2584_v9 = vpop.permute.xlu1 %2583  ;;  %1518 = vmatpush1.bf16.msra.mxu0 %v1482_v63  ;;  %v1504_v11 = vsel %vm668_vm6, %v2580_v1, %v2570_v10  ;;  %v1505_v14 = vsel %vm668_vm6, %v2581_v0, %v2571_v8 }
 0x717   : > { %v1508_v28 = vpack.c.bf16 %v1501_v6, %v1500_v5  ;;  %v2586_v31 = vunpack.i.h.bf16 %v2584_v9  ;;  %v2585_v59 = vunpack.i.l.bf16 %v2584_v9  ;;  %v2589_v62 = vpop.permute.xlu0 %2588  ;;  %v1509_v32 = vpack.c.bf16 %v1505_v14, %v1504_v11 }
 0x718   : > { %v2591_v33 = vunpack.i.h.bf16 %v2589_v62  ;;  %v2590_v34 = vunpack.i.l.bf16 %v2589_v62 }
 0x719   : > { %2316 = vmatmul.mubr.msk.bf16.vlgmr.msra.gmra.mrb[24].mxu0 %vm428_vm0, %v1438_v4  ;;  %1605 = vmatprep.subr.bf16.mxu0 %v1509_v32 }
 0x71a   : > { %v1502_v36 = vsel %vm668_vm6, %v2585_v59, %v2590_v34  ;;  %v1503_v56 = vsel %vm668_vm6, %v2586_v31, %v2591_v33  ;;  %1606 = vmatpush1.bf16.msra.mxu0 %v1508_v28  ;;  %v1506_v58 = vsel %vm668_vm6, %v2590_v34, %v2585_v59  ;;  %v1507_v29 = vsel %vm668_vm6, %v2591_v33, %v2586_v31 }
 0x71b   : > { %v1510_v35 = vpack.c.bf16 %v1503_v56, %v1502_v36  ;;  %v1511_v39 = vpack.c.bf16 %v1507_v29, %v1506_v58  ;;  %1637 = vmatprep.mubr.bf16.mxu0 %v2698_v7  ;;  %v2594_v42 = vpop.permute.xlu0 %2593 }
 0x71c   : > { %v2596_v54 = vunpack.i.h.bf16 %v2594_v42  ;;  %v2595_v55 = vunpack.i.l.bf16 %v2594_v42 }
 0x71d   : > { %1607 = vmatprep.subr.bf16.mxu0 %v1511_v39 }
 0x71e   : > { %1608 = vmatpush1.bf16.msra.mxu0 %v1510_v35 }
 0x71f   : > { %1789 = vmatprep.subr.bf16.mxu0 %v3165_v27 }
 0x721   : > { %2318 = vmatmul.mubr.msk.bf16.vlgmr.msra.gmra.mrb[28].mxu0 %vm428_vm0, %v1442_v40 }
 0x722   : > { %1790 = vmatpush1.bf16.msra.mxu0 %v3161_v24  ;;  %1821 = vmatprep.mubr.bf16.mxu0 %v2698_v7 }
 0x727   : > { %v1653_v41 = vpop.permute.xlu1 %1652 }
 0x72b   : > { %v2599_v43 = vpop.permute.xlu1 %2598 }
 0x72c   : > { %v2601_v44 = vunpack.i.h.bf16 %v2599_v43  ;;  %v2600_v45 = vunpack.i.l.bf16 %v2599_v43 }
 0x72e   : > { %v1705_v46 = vsel %vm891_vm7, %v2601_v44, %v2596_v54  ;;  %v1704_v47 = vsel %vm891_vm7, %v2600_v45, %v2595_v55  ;;  %v1700_v48 = vsel %vm891_vm7, %v2595_v55, %v2600_v45  ;;  %v1701_v49 = vsel %vm891_vm7, %v2596_v54, %v2601_v44  ;;  %v1665_v44 = vld [vmem:[%s3490_s2 + $0x78] sm:$0xff] }
 0x72f   : > { %v1708_v50 = vpack.c.bf16 %v1705_v46, %v1704_v47  ;;  %v1709_v51 = vpack.c.bf16 %v1701_v49, %v1700_v48 }
 0x731   : > { %1743 = vmatprep.subr.bf16.mxu1 %v1709_v51 }
 0x732   : > { %1744 = vmatpush1.bf16.msra.mxu1 %v1708_v50 }
 0x774   : > { %v1595_v52 = vpop.f32.mrb[28].mxu1 }
 0x775   : > { %v1597_v53 = vpop.f32.mrb[29].mxu1 }
 0x776   : > { %v1599_v57 = vpop.f32.mrb[30].mxu1 }
 0x777   : > { %v1600_v63 = vpop.f32.mrb[31].mxu1 }
 0x7ec   : > { %v1549_v8 = vpop.f32.mrb[24].mxu0 }
 0x7ed   : > { %v1556_v10 = vmul.f32 %v1549_v8, %v3013_v2  ;;  %v1551_v12 = vpop.f32.mrb[25].mxu0 }
 0x7ee   : > { %v1557_v13 = vmul.f32 %v1551_v12, %v3016_v3  ;;  %v1553_v0 = vpop.f32.mrb[26].mxu0 }
 0x7ef   : > { %v1596_v1 = vadd.f32 %v1595_v52, %v1556_v10  ;;  %v1554_v4 = vpop.f32.mrb[27].mxu0  ;;  %v1666_v52 = vpack.c.bf16 %v1665_v44, %v1665_v44 }
 0x7f0   : > { %v1598_v5 = vadd.f32 %v1597_v53, %v1557_v13 }
 0x7f4   : > { %v1639_v6 = vpop.f32.mrb[28].mxu0 }
 0x7f5   : > { %v1646_v9 = vmul.f32 %v1639_v6, %v3024_v25  ;;  %v1641_v11 = vpop.f32.mrb[29].mxu0  ;;  %v1667_v25 = vld [vmem:[%s3490_s2 + $0x80] sm:$0xff] }
 0x7f6   : > { %v1647_v14 = vmul.f32 %v1641_v11, %v3027_v26  ;;  %v1643_v28 = vpop.f32.mrb[30].mxu0  ;;  %v1668_v30 = vpack.c.bf16 %v1667_v25, %v1667_v25 }
 0x7f7   : > { %v1648_v31 = vadd.f32 %v1646_v9, %v1596_v1  ;;  %v1644_v59 = vpop.f32.mrb[31].mxu0 }
 0x7f8   : > { %v1649_v62 = vadd.f32 %v1647_v14, %v1598_v5 }
 0x7f9   : > { %v1655_v32 = vadd.f32 %v1653_v41, %v1648_v31  ;;  %v1669_v31 = vld [vmem:[%s3490_s2 + $0x88] sm:$0xff] }
 0x7fa   : > { %v1656_v33 = vadd.f32 %v1653_v41, %v1649_v62 }
 0x7fb   : > { %v1659_v2 = vmul.f32 0.2, %v1655_v32  ;;  %vm1657_vm3 = vcmp.ge.f32.partialorder %v1655_v32, 0.0 }
 0x7fc   : > { %v1660_v34 = vmul.f32 0.2, %v1656_v33  ;;  %vm1658_vm6 = vcmp.ge.f32.partialorder %v1656_v33, 0.0 }
 0x7fd   : > { %v1661_v3 = vsel %vm1657_vm3, %v1655_v32, %v1659_v2  ;;  %v1670_v32 = vpack.c.bf16 %v1669_v31, %v1669_v31 }
 0x7fe   : > { %v2602_v36 = vpack.i.bf16 %v1661_v3, %v3255_v37  ;;  %v1662_v56 = vsel %vm1658_vm6, %v1656_v33, %v1660_v34  ;;  %v1682_v29 = vpack.c.bf16 %v1661_v3, %v3255_v37 }
 0x7ff   : > { %v2612_v26 = vpack.i.bf16 %v1662_v56, %v3257_v38  ;;  %v1683_v58 = vpack.c.bf16 %v1662_v56, %v3257_v38 }
 0x800   : > { %2603 = vrot.lane.b32.xlu0 %v2602_v36, %s2704_s29 }
 0x801   : > { %2613 = vrot.lane.b32.xlu1 %v2612_v26, %s2704_s29  ;;  %1791 = vmatprep.subr.bf16.mxu0 %v1683_v58  ;;  %s318_s29 = scalar_select %p317_p13, %s2769_s28, 1 }
 0x802   : > { %1792 = vmatpush1.bf16.msra.mxu0 %v1682_v29  ;;  %s2707_s28 = smov [#allocation4]  }
 0x803   : > { %1933 = vmatprep.subr.bf16.mxu0 %v3165_v27  ;;  %v1671_v27 = vld [vmem:[%s3492_s4 + $0x28] sm:$0xff]  ;;  %s2296_s14 = sshll.u32 %s318_s29, 1  ;;  %s3444_s29 = scalar_lea.hbm %s3495_s7, %s2333_s15 }
 0x804   : > { %2608 = vrot.lane.b32.xlu0 %v3159_v16, %s2705_s22  ;;  %v1896_v16 = vld [vmem:[%s3492_s4 + $0x40] sm:$0xff]  ;;  %s2638_s17 = sshll.u32 %s2707_s28, 4  ;;  %s2639_s17 = int_to_ptr.vmem [resolvable:$false] %s2638_s17 }
 0x805   : > { %2618 = vrot.lane.b32.xlu1 %v3163_v17, %s2705_s22  ;;  %2320 = vmatmul.mubr.msk.bf16.vlgmr.msra.gmra.mrb[32].mxu0 %vm428_vm0, %v1668_v30  ;;  %s2640_s18 = scalar_lea.vmem %s2639_s17, 256  ;;  %p2641_p3 = scmp.lt.s32.totalorder %s3446_s8, %s2639_s17 }
 0x806   : > { %1934 = vmatpush1.bf16.msra.mxu0 %v3161_v24  ;;  %1965 = vmatprep.mubr.bf16.mxu0 %v2698_v7  ;;  %v1897_v24 = vld [vmem:[%s3492_s4 + $0x48] sm:$0xff]  ;;  %p2642_p4 = scmp.lt.s32.totalorder %s2640_s18, %s2634_s16 }
 0x807   : > { %1935 = vmatprep.subr.bf16.mxu0 %v1683_v58 }
 0x808   : > { %2623 = vrot.lane.b32.xlu0 %v2602_v36, %s2705_s22  ;;  %p2643_p5 = por %p2642_p4, %p2641_p3 }
 0x809   : > { %2628 = vrot.lane.b32.xlu1 %v2612_v26, %s2705_s22  ;;  %s320_s22 = scalar_lea.vmem %s3489_s1, %s2296_s14  ;;  %s2196_s14 = scalar_lea.sflag [#allocation5], %s2806_s20 }
 0x80a   : > { %1936 = vmatpush1.bf16.msra.mxu0 %v1682_v29  ;;  %p2644_p7 = pnand %p2643_p5, %p2637_p2 }
 0x80c   : > { %1880 = vperm.xlu0 %2430, %v1671_v27  }
 0x80d   : > { %1916 = vperm.xlu1 %2511, %v1896_v16  }
 0x810   : > { %1921 = vperm.xlu0 %2430, %v1897_v24  }
 0x872   : > { %v2604_v17 = vpop.permute.xlu0 %2603 }
 0x873   : > { %v2606_v37 = vunpack.i.h.bf16 %v2604_v17  ;;  %v2605_v38 = vunpack.i.l.bf16 %v2604_v17  ;;  %v2614_v35 = vpop.permute.xlu1 %2613 }
 0x874   : > { %v2616_v39 = vunpack.i.h.bf16 %v2614_v35  ;;  %v2615_v40 = vunpack.i.l.bf16 %v2614_v35 }
 0x876   : > { %v1706_v41 = vsel %vm891_vm7, %v2615_v40, %v2605_v38  ;;  %v1707_v42 = vsel %vm891_vm7, %v2616_v39, %v2606_v37  ;;  %v2609_v43 = vpop.permute.xlu0 %2608  ;;  %v1702_v54 = vsel %vm891_vm7, %v2605_v38, %v2615_v40  ;;  %v1703_v55 = vsel %vm891_vm7, %v2606_v37, %v2616_v39 }
 0x877   : > { %v1710_v45 = vpack.c.bf16 %v1707_v42, %v1706_v41  ;;  %v2611_v46 = vunpack.i.h.bf16 %v2609_v43  ;;  %v2610_v47 = vunpack.i.l.bf16 %v2609_v43  ;;  %v2619_v48 = vpop.permute.xlu1 %2618  ;;  %v1711_v49 = vpack.c.bf16 %v1703_v55, %v1702_v54 }
 0x878   : > { %v2621_v50 = vunpack.i.h.bf16 %v2619_v48  ;;  %v2620_v51 = vunpack.i.l.bf16 %v2619_v48 }
 0x879   : > { %1745 = vmatprep.subr.bf16.mxu1 %v1711_v49 }
 0x87a   : > { %v1728_v53 = vsel %vm920_vm10, %v2610_v47, %v2620_v51  ;;  %v1729_v57 = vsel %vm920_vm10, %v2611_v46, %v2621_v50  ;;  %v2624_v63 = vpop.permute.xlu0 %2623  ;;  %1746 = vmatpush1.bf16.msra.mxu1 %v1710_v45  ;;  %v1732_v8 = vsel %vm920_vm10, %v2620_v51, %v2610_v47  ;;  %v1733_v10 = vsel %vm920_vm10, %v2621_v50, %v2611_v46  ;;  %v334_v46 = vld [vmem:[%s3494_s6 + $0x8] sm:$0xc0] }
 0x87b   : > { %v1736_v12 = vpack.c.bf16 %v1729_v57, %v1728_v53  ;;  %v2626_v13 = vunpack.i.h.bf16 %v2624_v63  ;;  %v2625_v0 = vunpack.i.l.bf16 %v2624_v63  ;;  %v2629_v1 = vpop.permute.xlu1 %2628  ;;  %v1737_v4 = vpack.c.bf16 %v1733_v10, %v1732_v8 }
 0x87c   : > { %v2631_v5 = vunpack.i.h.bf16 %v2629_v1  ;;  %v2630_v6 = vunpack.i.l.bf16 %v2629_v1  ;;  %v1991_v47 = vrot.slane %v334_v46, 6 }
 0x87d   : > { %2319 = vmatmul.mubr.msk.bf16.vlgmr.msra.gmra.mrb[32].mxu1 %vm428_vm0, %v1666_v52  ;;  %1833 = vmatprep.subr.bf16.mxu1 %v1737_v4  ;;  %v2065_v4 = vld [vmem:[%s3493_s5 + $0x8] sm:$0xff] }
 0x87e   : > { %v1730_v9 = vsel %vm920_vm10, %v2625_v0, %v2630_v6  ;;  %v1731_v11 = vsel %vm920_vm10, %v2626_v13, %v2631_v5  ;;  %1834 = vmatpush1.bf16.msra.mxu1 %v1736_v12  ;;  %v1734_v14 = vsel %vm920_vm10, %v2630_v6, %v2625_v0  ;;  %v1735_v28 = vsel %vm920_vm10, %v2631_v5, %v2626_v13  ;;  %v2067_v5 = vld [vmem:[%s3493_s5 + $0x18] sm:$0xff] }
 0x87f   : > { %v1738_v59 = vpack.c.bf16 %v1731_v11, %v1730_v9  ;;  %v1739_v62 = vpack.c.bf16 %v1735_v28, %v1734_v14  ;;  %1865 = vmatprep.mubr.bf16.mxu1 %v2698_v7 }
 0x881   : > { %1835 = vmatprep.subr.bf16.mxu1 %v1739_v62  ;;  %v333_v62 = vld [vmem:[%s3494_s6] sm:$0xc0] }
 0x882   : > { %1836 = vmatpush1.bf16.msra.mxu1 %v1738_v59  ;;  %v2338_v59 = vpack.c.bf16 %v2067_v5, %v2065_v4 }
 0x885   : > { %2321 = vmatmul.mubr.msk.bf16.vlgmr.msra.gmra.mrb[36].mxu1 %vm428_vm0, %v1670_v32  ;;  %v2064_v32 = vld [vmem:[%s3493_s5] sm:$0xff] }
 0x886   : > { %2058 = vmatprep.mubr.f32.mxu1 %v1991_v47 }
 0x88b   : > { %v1881_v35 = vpop.permute.xlu0 %1880 }
 0x88c   : > { %v1917_v48 = vpop.permute.xlu1 %1916 }
 0x88f   : > { %v1922_v52 = vpop.permute.xlu0 %1921 }
 0x8d8   : > { %v1823_v33 = vpop.f32.mrb[32].mxu0 }
 0x8d9   : > { %v1825_v2 = vpop.f32.mrb[33].mxu0 }
 0x8da   : > { %v1827_v34 = vpop.f32.mrb[34].mxu0 }
 0x8db   : > { %v1828_v3 = vpop.f32.mrb[35].mxu0 }
 0x950   : > { %v1777_v36 = vpop.f32.mrb[32].mxu1 }
 0x951   : > { %v1784_v18 = vmul.f32 %v1777_v36, %v3131_v60  ;;  %v1779_v56 = vpop.f32.mrb[33].mxu1 }
 0x952   : > { %v1785_v25 = vmul.f32 %v1779_v56, %v3134_v61  ;;  %v1781_v26 = vpop.f32.mrb[34].mxu1 }
 0x953   : > { %v1824_v58 = vadd.f32 %v1823_v33, %v1784_v18  ;;  %v1782_v29 = vpop.f32.mrb[35].mxu1  ;;  %v2066_v33 = vld [vmem:[%s3493_s5 + $0x10] sm:$0xff]  ;;  %v2324_v18 = vld [vmem:[%s3493_s5 + $0x20] ss:$8 sm:$0x3] }
 0x954   : > { %v1826_v30 = vadd.f32 %v1825_v2, %v1785_v25  ;;  %v1990_v2 = vrot.slane %v333_v62, 6  ;;  %v2340_v34 = vpack.c.bf16 %v2066_v33, %v2064_v32  ;;  %v2078_v56 = vrot.slane %v2324_v18, %v2907_v22  ;;  %v2158_v25 = vld [vmem:[%s320_s22] sm:$0x3] }
 0x958   : > { %v1867_v7 = vpop.f32.mrb[36].mxu1 }
 0x959   : > { %v1874_v27 = vmul.f32 %v1867_v7, %v3142_v20  ;;  %v1869_v16 = vpop.f32.mrb[37].mxu1  ;;  %v1893_v20 = vld [vmem:[%s3491_s3 + $0x10] sm:$0xff] }
 0x95a   : > { %v1875_v24 = vmul.f32 %v1869_v16, %v3145_v23  ;;  %v1871_v17 = vpop.f32.mrb[38].mxu1  ;;  %v1894_v23 = vld [vmem:[%s3491_s3 + $0x18] sm:$0xff] }
 0x95b   : > { %v1876_v37 = vadd.f32 %v1874_v27, %v1824_v58  ;;  %v1872_v38 = vpop.f32.mrb[39].mxu1  ;;  %v1895_v45 = vpack.c.bf16 %v1894_v23, %v1893_v20 }
 0x95c   : > { %v1877_v39 = vadd.f32 %v1875_v24, %v1826_v30  ;;  %v2165_v30 = vmul.f32 0.5, %v2158_v25 }
 0x95d   : > { %v1883_v40 = vadd.f32 %v1881_v35, %v1876_v37 }
 0x95e   : > { %v1884_v60 = vadd.f32 %v1881_v35, %v1877_v39  ;;  %v2166_v17 = vmul.f32 %v2165_v30, %v2158_v25 }
 0x95f   : > { %v1887_v41 = vmul.f32 0.2, %v1883_v40  ;;  %vm1885_vm0 = vcmp.ge.f32.partialorder %v1883_v40, 0.0 }
 0x960   : > { %vm1886_vm7 = vcmp.ge.f32.partialorder %v1884_v60, 0.0  ;;  %v1888_v61 = vmul.f32 0.2, %v1884_v60 }
 0x961   : > { %v1889_v42 = vsel %vm1885_vm0, %v1883_v40, %v1887_v41 }
 0x962   : > { %v1890_v43 = vsel %vm1886_vm7, %v1884_v60, %v1888_v61  ;;  %v1912_v54 = vpack.c.bf16 %v1889_v42, %v1889_v42  ;;  %v2706_v60 = vmov 1983009808  }
 0x963   : > { %v1913_v55 = vpack.c.bf16 %v1890_v43, %v1890_v43  ;;  %v2179_v41 = vunpack.c.l.s4 %v2706_v60 }
 0x964   : > { %v1928_v44 = vsel %vm1143_vm13, %v1912_v54, 0 }
 0x965   : > { %2322 = vmatprep.subr.msk.bf16.mxu0 %vm1143_vm13, %v1913_v55  ;;  %vm2081_vm13 = vcmask 130048   ;;  %v2180_v61 = vunpack.c.0.s8 %v2179_v41 }
 0x966   : > { %1938 = vmatpush1.bf16.msra.mxu0 %v1928_v44 }
 0x967   : > { %v2183_v42 = vsub.s32 %v2180_v61, %v2901_v19 }
 0x969   : > { %2323 = vmatmul.mubr.msk.bf16.vlgmr.msra.gmra.mrb[36].mxu0 %vm1139_vm14, %v1895_v45  ;;  %vm2168_vm14 = vcmask 1041408  }
 0xa3c   : > { %v1967_v49 = vpop.f32.mrb[36].mxu0 }
 0xa3d   : > { %v1968_v50 = vadd.f32 %v1967_v49, %v1917_v48  ;;  %v1969_v51 = vpop.f32.mrb[37].mxu0 }
 0xa3e   : > { %v1970_v53 = vadd.f32 %v1969_v51, %v1917_v48  ;;  %v1971_v57 = vpop.f32.mrb[38].mxu0 }
 0xa3f   : > { %v1980_v63 = vmul.f32 0.2, %v1968_v50  ;;  %v1972_v8 = vadd.f32 %v1971_v57, %v1922_v52  ;;  %v1973_v10 = vpop.f32.mrb[39].mxu0  ;;  %vm1976_vm9 = vcmp.ge.f32.partialorder %v1968_v50, 0.0 }
 0xa40   : > { %v1981_v12 = vmul.f32 0.2, %v1970_v53  ;;  %v1974_v13 = vadd.f32 %v1973_v10, %v1922_v52  ;;  %vm1977_vm10 = vcmp.ge.f32.partialorder %v1970_v53, 0.0 }
 0xa41   : > { %vm1978_vm11 = vcmp.ge.f32.partialorder %v1972_v8, 0.0  ;;  %v1982_v0 = vmul.f32 0.2, %v1972_v8  ;;  %v1984_v6 = vsel %vm1976_vm9, %v1968_v50, %v1980_v63 }
 0xa42   : > { %vm1979_vm12 = vcmp.ge.f32.partialorder %v1974_v13, 0.0  ;;  %v1983_v1 = vmul.f32 0.2, %v1974_v13  ;;  %v1985_v14 = vsel %vm1977_vm10, %v1970_v53, %v1981_v12 }
 0xa43   : > { %v1986_v9 = vsel %vm1978_vm11, %v1972_v8, %v1982_v0 }
 0xa44   : > { %v2336_v11 = vpack.c.bf16 %v1986_v9, %v1984_v6  ;;  %v1987_v28 = vsel %vm1979_vm12, %v1974_v13, %v1983_v1 }
 0xa45   : > { %v2334_v31 = vpack.c.bf16 %v1987_v28, %v1985_v14 }
 0xa47   : > { %2335 = vmatprep.subr.bf16.mxu1 %v2334_v31 }
 0xa48   : > { %2337 = vmatpush1.bf16.xpose.msra.mxu1 %v2336_v11 }
 0xa49   : > { %2339 = vmatprep.subr.bf16.mxu1 %v2338_v59 }
 0xa4f   : > { %2059 = vmatmul.mubr.f32.vlgmr.msra.gmra.mrb[40].mxu1 %v1990_v2 }
 0xa50   : > { %2341 = vmatpush1.bf16.msra.mxu1 %v2340_v34  ;;  %2149 = vmatprep.mubr.f32.mxu1 %v2701_v15  ;;  %v2074_v15 = vrot.slane %v2324_v18, %v2904_v21 }
 0xb22   : > { %v2060_v3 = vpop.f32.mrb[40].mxu1 }
 0xb23   : > { %v2062_v36 = vpop.f32.mrb[41].mxu1  ;;  %2325 = vmatmul.mubr.msk.f32.vlgmr.msra.gmra.mrb[42].mxu1 %vm2081_vm13, %v2060_v3 }
 0xbf6   : > { %v2151_v26 = vpop.f32.mrb[42].mxu1 }
 0xbf7   : > { %v2153_v58 = vpop.f32.mrb[43].mxu1  ;;  %v2152_v7 = vadd.f32 %v2151_v26, %v2074_v15 }
 0xbf8   : > { %v2154_v29 = vadd.f32 %v2153_v58, %v2078_v56 }
 0xbfa   : > { %v2326_v27 = vclamps-f32 %v2154_v29, 10.0 }
 0xbfc   : > { %v2159_v16 = vmul.f32 0.5, %v2326_v27  ;;  %v2176_v24 = vcombine.low %v2152_v7, %v2326_v27 }
 0xbfe   : > { %v2160_v37 = vmul.f32 1.442695, %v2159_v16  ;;  %v2164_v38 = vsub.f32 -0.9189385, %v2159_v16  ;;  %v2184_v20 = vrot.slane %v2176_v24, %v2183_v42 }
 0xc00   : > { %2632 = vpow2.f32 %v2160_v37  ;;  %v2167_v35 = vsub.f32 %v2164_v38, %v2166_v17 }
 0xc02   : > { %v2169_v22 = vsel %vm2168_vm14, %v2167_v35, 0.0 }
 0xc03   : > { %2170 = vadd.xlane.f32.xlu1 %v2169_v22 }
 0xc0a   : > { %v2633_v39 = vpop.eup %2632 }
 0xc0b   : > { %v2162_v21 = vmul.f32 %v2633_v39, %v2158_v25 }
 0xc0d   : > { %v2163_v40 = vadd.f32 %v2162_v21, %v2152_v7 }
 0xc90   : > { %v2171_v43 = vpop.xlane.xlu1 %2170 }
 0xc91   : > { %v2177_v54 = vcombine.low %v2163_v40, %v2171_v43 }
 0xc93   : > { %v2191_v23 = vrot.slane %v2177_v54, %v2183_v42 }
 0xc95   : > { %v2192_v55 = vcombine.low %v2184_v20, %v2191_v23 }
 0xc97   : > { %2194 = vst [vmem:[%s315_s21] sm:$0xff] %v2192_v55 }
 0xc98   : > { %2647 = shalt.err (!%p2644_p7)
}
 0xc99   : > { %s2648_s20 = scalar_lea.hbm %s3444_s29, 128  ;;  %s2652_s19 = scalar_lea.hbm %s3495_s7, 256 }
 0xc9a   : > { %p2649_p10 = scmp.ne.s32.totalorder %s3444_s29, %s2648_s20  ;;  %p2653_p13 = scmp.lt.u32.totalorder %s3444_s29, %s3495_s7 }
 0xc9b   : > { %p2654_p0 = scmp.lt.u32.totalorder %s2652_s19, %s2648_s20  ;;  %p2656_p2 = scmp.lt.u32.totalorder %s2648_s20, %s3444_s29 }
 0xc9c   : > { %p2650_p11 = pnand %p2649_p10, %p2787_p6 }
 0xc9d   : > { %p2655_p1 = por %p2654_p0, %p2653_p13 }
 0xc9e   : > { %p2651_p12 = pneg %p2650_p11 }
 0xc9f   : > { %p2657_p3 = por %p2656_p2, %p2655_p1 }
 0xca1   : > { %p2658_p4 = pnand %p2657_p3, %p2651_p12 }
 0xca3   : > { %2661 = shalt.err (!%p2658_p4)
}
 0xca4   : > { %2342 = dma.vmem_to_hbm [thread:$0]  (%p2787_p6), %s3446_s8, 128, %s3444_s29, %s2196_s14  }
 0xca5 PF: > { %s2222_s23 = sand.u32 1, %s2684_s24   ;;  %p2345_p5 = pnand %p2289_p9, %p2791_p8 }
 0xca6   : > { %s2223_s13 = scalar_lea.sflag [#allocation5], %s2222_s23 }
 0xca7   : > { %2679 = dma.done.wait (!%p2345_p5), %s2223_s13, 128  }
 0xca8   : > { %2681 = vsyncadd (!%p2345_p5), %s2223_s13, 4294967168  ;;  %p17_p7 = scmp.ge.s32.totalorder %s2773_s30, 4   ;;  %s3498_s24 = smov %s2688_s25 }
 0xca9   : > { %s3499_s25 = smov %s2692_s26  ;;  %s3500_s26 = smov %s2785_s10 }
 0xcaa   : > { %s3501_s27 = smov %s2773_s30  ;;  %19 = sbr.rel (!%p17_p7) target bundleno = 3 (0x3), region = 120 }
 0xcb1   :  { %2228 = vsyncpa [#allocation5], 1 }
 0xcb2   :  { %2230 = vsyncpa [#allocation5 + $0x1], 1 }

</bundles_post_ra>
